<compile_context>
chip_gen: v7x
topology: tpu7x:2x2x1
jax: 0.10.0
libtpu: 0.0.40
codegen_flags: <defaults>
</compile_context>

<pallas_src>
import jax
import jax.numpy as jnp
import numpy as np
from jax import lax
from jax.experimental import pallas as pl
from jax.experimental.pallas import tpu as pltpu

# hyperparameters (stand-ins for params.* in the original project)
GRU_SIZE = 32
GRU_LAYERS = 1
LSTM_SIZE = 32
LSTM_LAYERS = 1
ATTENTION_SIZE = 16
DROPOUT = 0.2  # unused at inference


def gru_lstm_attn_kernel(
    x_ref,                              # (T, B, D)  f32   (B already padded to %8==0)
    bn_scale_ref, bn_bias_ref,          # (1, D)     folded input BatchNorm1d
    gru_wih_ref, gru_whh_ref,           # (D, 3H), (H, 3H)   (transposed torch weights)
    gru_bih_ref, gru_bhh_ref,           # (1, 3H)
    lstm_w_ref, lstm_b_ref,             # (H+L, 4L) fused [W_ih;W_hh], (1, 4L) merged bias
    att_w1_ref, att_b1_ref,             # (L, A), (1, A)
    att_w2_ref, att_b2_ref,             # (1, A), (1, 1)
    fc_bn1_scale_ref, fc_bn1_bias_ref,  # (1, L)     folded BatchNorm1d(L)
    fc_w1_ref, fc_b1_ref,               # (L, L//2), (1, L//2)
    fc_bn2_scale_ref, fc_bn2_bias_ref,  # (1, L//2)  folded BatchNorm1d(L//2)
    fc_w2_ref, fc_b2_ref,               # (1, L//2), (1, 1)
    out_ref,                            # (B, 1)
    gi_ref,                             # scratch VMEM (T, B, 3H)  hoisted GRU input proj
    lstm_seq_ref,                       # scratch VMEM (T, B, L)
):
    T, B, D = x_ref.shape
    H = gru_whh_ref.shape[0]
    L = lstm_seq_ref.shape[2]
    A = att_w1_ref.shape[1]
    TB = T * B

    # Hoist weight loads out of the recurrent loop.
    gru_whh = gru_whh_ref[...]
    gru_bhh = gru_bhh_ref[...]
    lstm_w = lstm_w_ref[...]            # fused [W_ih; W_hh]
    lstm_b = lstm_b_ref[...]            # merged b_ih + b_hh

    # ---- hoisted: eval-mode BatchNorm1d + GRU input projection for ALL timesteps ----
    # (T,B,D) -> (T*B,D) is a layout no-op because B is a multiple of 8 (sublane tile).
    xb = x_ref[...] * bn_scale_ref[...] + bn_bias_ref[...]          # (T, B, D)
    gi_ref[...] = (
        jnp.dot(xb.reshape(TB, D), gru_wih_ref[...],
                preferred_element_type=jnp.float32).reshape(T, B, 3 * H)
        + gru_bih_ref[...]
    )

    def step(t, carry):
        h_gru, h_lstm, c_lstm = carry

        # ---- GRU cell (PyTorch gate order: r, z, n) ----
        gi = gi_ref[t]                                               # (B, 3H) precomputed
        gh = jnp.dot(h_gru, gru_whh, preferred_element_type=jnp.float32) + gru_bhh
        gsum = gi + gh                                               # one add on full tile
        r = jax.nn.sigmoid(gsum[:, 0:H])
        z = jax.nn.sigmoid(gsum[:, H:2 * H])
        n = jnp.tanh(gi[:, 2 * H:3 * H] + r * gh[:, 2 * H:3 * H])
        h_gru_new = (1.0 - z) * n + z * h_gru

        # ---- LSTM cell (PyTorch gate order: i, f, g, o), single fused matmul ----
        hcat = jnp.concatenate([h_gru_new, h_lstm], axis=-1)         # (B, H+L)
        g = jnp.dot(hcat, lstm_w, preferred_element_type=jnp.float32) + lstm_b
        i_g = jax.nn.sigmoid(g[:, 0:L])
        f_g = jax.nn.sigmoid(g[:, L:2 * L])
        g_g = jnp.tanh(g[:, 2 * L:3 * L])
        o_g = jax.nn.sigmoid(g[:, 3 * L:4 * L])
        c_new = f_g * c_lstm + i_g * g_g
        h_lstm_new = o_g * jnp.tanh(c_new)

        lstm_seq_ref[t] = h_lstm_new
        return (h_gru_new, h_lstm_new, c_new)

    init = (jnp.zeros((B, H), jnp.float32),
            jnp.zeros((B, L), jnp.float32),
            jnp.zeros((B, L), jnp.float32))
    # T is static & small: fully unroll so cross-timestep overlap is visible to the scheduler.
    lax.fori_loop(0, T, step, init, unroll=True)

    # ---- attention over time ----
    lstm_seq = lstm_seq_ref[...]                                     # (T, B, L)
    # (T,B,L) -> (T*B,L) is tile-aligned (B % 8 == 0) -> no relayout.
    h1 = jnp.tanh(
        jnp.dot(lstm_seq.reshape(TB, L), att_w1_ref[...],
                preferred_element_type=jnp.float32).reshape(T, B, A)
        + att_b1_ref[...]
    )                                                                # (T, B, A)
    e = jnp.sum(h1 * att_w2_ref[...], axis=-1, keepdims=True) + att_b2_ref[...]  # (T, B, 1)
    e = e - jnp.max(e, axis=0, keepdims=True)
    w = jnp.exp(e)
    w = w / jnp.sum(w, axis=0, keepdims=True)                        # softmax over T
    context = jnp.sum(w * lstm_seq, axis=0)                          # (B, L)

    # ---- fc head: BN -> Linear -> ReLU -> (Dropout: identity) -> BN -> Linear ----
    y = context * fc_bn1_scale_ref[...] + fc_bn1_bias_ref[...]
    y = jnp.dot(y, fc_w1_ref[...], preferred_element_type=jnp.float32) + fc_b1_ref[...]
    y = jnp.maximum(y, 0.0)
    y = y * fc_bn2_scale_ref[...] + fc_bn2_bias_ref[...]
    out = jnp.sum(y * fc_w2_ref[...], axis=-1, keepdims=True) + fc_b2_ref[...]   # (B, 1)
    out_ref[...] = out


def gru_lstm_attention_forward(x, p):
    """x: (B, T, D) float32 -> (B, 1) float32."""
    B, T, D = x.shape
    # Pad batch to the f32 sublane quantum so vregs are filled and reshapes are tile-aligned.
    BP = max(8, ((B + 7) // 8) * 8)
    x_tbd = jnp.transpose(x, (1, 0, 2)).astype(jnp.float32)          # (T, B, D)
    if BP != B:
        x_tbd = jnp.pad(x_tbd, ((0, 0), (0, BP - B), (0, 0)))        # (T, BP, D)

    # Fuse LSTM input/recurrent weights and merge biases (done once, outside the kernel).
    lstm_w = jnp.concatenate([p["lstm_wih"], p["lstm_whh"]], axis=0)  # (H+L, 4L)
    lstm_b = p["lstm_bih"] + p["lstm_bhh"]                            # (1, 4L)

    args = [
        x_tbd,
        p["bn_scale"], p["bn_bias"],
        p["gru_wih"], p["gru_whh"], p["gru_bih"], p["gru_bhh"],
        lstm_w, lstm_b,
        p["att_w1"], p["att_b1"], p["att_w2"], p["att_b2"],
        p["fc_bn1_scale"], p["fc_bn1_bias"],
        p["fc_w1"], p["fc_b1"],
        p["fc_bn2_scale"], p["fc_bn2_bias"],
        p["fc_w2"], p["fc_b2"],
    ]
    vmem = pl.BlockSpec(memory_space=pltpu.MemorySpace.VMEM)
    out = pl.pallas_call(
        gru_lstm_attn_kernel,
        out_shape=jax.ShapeDtypeStruct((BP, 1), jnp.float32),
        in_specs=[vmem] * len(args),
        out_specs=vmem,
        scratch_shapes=[
            pltpu.VMEM((T, BP, 3 * GRU_SIZE), jnp.float32),   # hoisted GRU input projection
            pltpu.VMEM((T, BP, LSTM_SIZE), jnp.float32),      # lstm_out sequence
        ],
    )(*args)
    return out[:B]  # drop padded batch rows (they never affect real rows)


gru_lstm_attention_forward_jit = jax.jit(gru_lstm_attention_forward)


def init_params(key, D, H, L, A):
    """Deterministic parameter init mirroring the PyTorch module's shapes."""
    L2 = L // 2
    ks = jax.random.split(key, 26)
    u = lambda k, shape, b: jax.random.uniform(k, shape, jnp.float32, -b, b)
    kH = 1.0 / np.sqrt(H)
    kL = 1.0 / np.sqrt(L)
    eps = 1e-5
    p = {}

    # input BatchNorm1d(D), eval mode, folded into scale/bias
    gamma = 1.0 + 0.1 * jax.random.normal(ks[0], (D,), jnp.float32)
    beta = 0.1 * jax.random.normal(ks[1], (D,), jnp.float32)
    rmean = 0.1 * jax.random.normal(ks[2], (D,), jnp.float32)
    rvar = 1.0 + 0.1 * jnp.abs(jax.random.normal(ks[3], (D,), jnp.float32))
    s = gamma / jnp.sqrt(rvar + eps)
    p["bn_scale"] = s.reshape(1, D)
    p["bn_bias"] = (beta - rmean * s).reshape(1, D)

    # GRU(D -> H): torch weight_ih_l0 is (3H, D); stored transposed for x @ W
    p["gru_wih"] = u(ks[4], (D, 3 * H), kH)
    p["gru_whh"] = u(ks[5], (H, 3 * H), kH)
    p["gru_bih"] = u(ks[6], (1, 3 * H), kH)
    p["gru_bhh"] = u(ks[7], (1, 3 * H), kH)

    # LSTM(H -> L)
    p["lstm_wih"] = u(ks[8], (H, 4 * L), kL)
    p["lstm_whh"] = u(ks[9], (L, 4 * L), kL)
    p["lstm_bih"] = u(ks[10], (1, 4 * L), kL)
    p["lstm_bhh"] = u(ks[11], (1, 4 * L), kL)

    # attention: Linear(L, A) -> Tanh -> Linear(A, 1)
    p["att_w1"] = u(ks[12], (L, A), 1.0 / np.sqrt(L))
    p["att_b1"] = u(ks[13], (1, A), 1.0 / np.sqrt(L))
    p["att_w2"] = u(ks[14], (1, A), 1.0 / np.sqrt(A))   # row vector of Linear(A,1)
    p["att_b2"] = u(ks[15], (1, 1), 1.0 / np.sqrt(A))

    # fc head: BN(L) -> Linear(L, L//2) -> ReLU -> Dropout -> BN(L//2) -> Linear(L//2, 1)
    g1 = 1.0 + 0.1 * jax.random.normal(ks[16], (L,), jnp.float32)
    b1 = 0.1 * jax.random.normal(ks[17], (L,), jnp.float32)
    m1 = 0.1 * jax.random.normal(ks[18], (L,), jnp.float32)
    s1 = g1 / jnp.sqrt(1.0 + eps)
    p["fc_bn1_scale"] = s1.reshape(1, L)
    p["fc_bn1_bias"] = (b1 - m1 * s1).reshape(1, L)
    p["fc_w1"] = u(ks[19], (L, L2), 1.0 / np.sqrt(L))
    p["fc_b1"] = u(ks[20], (1, L2), 1.0 / np.sqrt(L))
    g2 = 1.0 + 0.1 * jax.random.normal(ks[21], (L2,), jnp.float32)
    b2 = 0.1 * jax.random.normal(ks[22], (L2,), jnp.float32)
    s2 = g2 / jnp.sqrt(1.0 + eps)
    p["fc_bn2_scale"] = s2.reshape(1, L2)
    p["fc_bn2_bias"] = b2.reshape(1, L2)
    p["fc_w2"] = u(ks[23], (1, L2), 1.0 / np.sqrt(L2))  # row vector of Linear(L2,1)
    p["fc_b2"] = u(ks[24], (1, 1), 1.0 / np.sqrt(L2))
    return p


def reference_forward(x, p):
    """Pure-JAX reference of the same forward pass (for validation)."""
    B, T, D = x.shape
    H, L = GRU_SIZE, LSTM_SIZE
    xb = x * p["bn_scale"] + p["bn_bias"]
    h = jnp.zeros((B, H), jnp.float32)
    hl = jnp.zeros((B, L), jnp.float32)
    cl = jnp.zeros((B, L), jnp.float32)
    outs = []
    for t in range(T):
        xt = xb[:, t, :]
        gi = xt @ p["gru_wih"] + p["gru_bih"]
        gh = h @ p["gru_whh"] + p["gru_bhh"]
        r = jax.nn.sigmoid(gi[:, :H] + gh[:, :H])
        z = jax.nn.sigmoid(gi[:, H:2 * H] + gh[:, H:2 * H])
        n = jnp.tanh(gi[:, 2 * H:] + r * gh[:, 2 * H:])
        h = (1.0 - z) * n + z * h
        g = h @ p["lstm_wih"] + hl @ p["lstm_whh"] + p["lstm_bih"] + p["lstm_bhh"]
        i_g = jax.nn.sigmoid(g[:, :L])
        f_g = jax.nn.sigmoid(g[:, L:2 * L])
        g_g = jnp.tanh(g[:, 2 * L:3 * L])
        o_g = jax.nn.sigmoid(g[:, 3 * L:])
        cl = f_g * cl + i_g * g_g
        hl = o_g * jnp.tanh(cl)
        outs.append(hl)
    lstm_out = jnp.stack(outs, axis=1)                            # (B, T, L)
    h1 = jnp.tanh(lstm_out @ p["att_w1"] + p["att_b1"])
    e = jnp.sum(h1 * p["att_w2"], axis=-1, keepdims=True) + p["att_b2"][0, 0]
    wts = jax.nn.softmax(e, axis=1)
    context = jnp.sum(wts * lstm_out, axis=1)                     # (B, L)
    y = context * p["fc_bn1_scale"] + p["fc_bn1_bias"]
    y = jnp.maximum(y @ p["fc_w1"] + p["fc_b1"], 0.0)
    y = y * p["fc_bn2_scale"] + p["fc_bn2_bias"]
    return jnp.sum(y * p["fc_w2"], axis=-1, keepdims=True) + p["fc_b2"][0, 0]


if __name__ == "__main__":
    key = jax.random.PRNGKey(0)
    kx, kp = jax.random.split(key)
    B, T, D = 2, 8, 16                                            # batch, seq, input_size
    x = jax.random.normal(kx, (B, T, D), jnp.float32)
    params = init_params(kp, D, GRU_SIZE, LSTM_SIZE, ATTENTION_SIZE)

    out = gru_lstm_attention_forward_jit(x, params)
    out = jax.block_until_ready(out)
    assert out.shape == (B, 1), out.shape

    ref = jax.block_until_ready(reference_forward(x, params))
    np.testing.assert_allclose(np.asarray(out), np.asarray(ref), rtol=1e-4, atol=1e-4)
    print("KERNEL_OK")
</pallas_src>

<mosaic_0001>
module attributes {stable_mosaic.version = 11 : i64} {
  func.func @gru_lstm_attn_kernel(%arg0: memref<8x8x16xf32, #tpu.memory_space<vmem>>, %arg1: memref<1x16xf32, #tpu.memory_space<vmem>>, %arg2: memref<1x16xf32, #tpu.memory_space<vmem>>, %arg3: memref<16x96xf32, #tpu.memory_space<vmem>>, %arg4: memref<32x96xf32, #tpu.memory_space<vmem>>, %arg5: memref<1x96xf32, #tpu.memory_space<vmem>>, %arg6: memref<1x96xf32, #tpu.memory_space<vmem>>, %arg7: memref<64x128xf32, #tpu.memory_space<vmem>>, %arg8: memref<1x128xf32, #tpu.memory_space<vmem>>, %arg9: memref<32x16xf32, #tpu.memory_space<vmem>>, %arg10: memref<1x16xf32, #tpu.memory_space<vmem>>, %arg11: memref<1x16xf32, #tpu.memory_space<vmem>>, %arg12: memref<1x1xf32, #tpu.memory_space<vmem>>, %arg13: memref<1x32xf32, #tpu.memory_space<vmem>>, %arg14: memref<1x32xf32, #tpu.memory_space<vmem>>, %arg15: memref<32x16xf32, #tpu.memory_space<vmem>>, %arg16: memref<1x16xf32, #tpu.memory_space<vmem>>, %arg17: memref<1x16xf32, #tpu.memory_space<vmem>>, %arg18: memref<1x16xf32, #tpu.memory_space<vmem>>, %arg19: memref<1x16xf32, #tpu.memory_space<vmem>>, %arg20: memref<1x1xf32, #tpu.memory_space<vmem>>, %arg21: memref<8x1xf32, #tpu.memory_space<vmem>>, %arg22: memref<8x8x96xf32, #tpu.memory_space<vmem>>, %arg23: memref<8x8x32xf32, #tpu.memory_space<vmem>>) attributes {dimension_semantics = [], scalar_prefetch = 0 : i64, scratch_operands = 2 : i64, tpu.core_type = #tpu.core_type<tc>} {
    %c0 = arith.constant 0 : index
    %c0_0 = arith.constant 0 : index
    %0 = vector.load %arg4[%c0, %c0_0] : memref<32x96xf32, #tpu.memory_space<vmem>>, vector<32x96xf32>
    %c0_1 = arith.constant 0 : index
    %c0_2 = arith.constant 0 : index
    %1 = vector.load %arg6[%c0_1, %c0_2] : memref<1x96xf32, #tpu.memory_space<vmem>>, vector<1x96xf32>
    %c0_3 = arith.constant 0 : index
    %c0_4 = arith.constant 0 : index
    %2 = vector.load %arg7[%c0_3, %c0_4] : memref<64x128xf32, #tpu.memory_space<vmem>>, vector<64x128xf32>
    %c0_5 = arith.constant 0 : index
    %c0_6 = arith.constant 0 : index
    %3 = vector.load %arg8[%c0_5, %c0_6] : memref<1x128xf32, #tpu.memory_space<vmem>>, vector<1x128xf32>
    %c0_7 = arith.constant 0 : index
    %c0_8 = arith.constant 0 : index
    %c0_9 = arith.constant 0 : index
    %4 = vector.load %arg0[%c0_7, %c0_8, %c0_9] : memref<8x8x16xf32, #tpu.memory_space<vmem>>, vector<8x8x16xf32>
    %c0_10 = arith.constant 0 : index
    %c0_11 = arith.constant 0 : index
    %5 = vector.load %arg1[%c0_10, %c0_11] : memref<1x16xf32, #tpu.memory_space<vmem>>, vector<1x16xf32>
    %6 = vector.shape_cast %5 : vector<1x16xf32> to vector<1x1x16xf32>
    %7 = vector.broadcast %6 : vector<1x1x16xf32> to vector<8x8x16xf32>
    %8 = arith.mulf %4, %7 : vector<8x8x16xf32>
    %c0_12 = arith.constant 0 : index
    %c0_13 = arith.constant 0 : index
    %9 = vector.load %arg2[%c0_12, %c0_13] : memref<1x16xf32, #tpu.memory_space<vmem>>, vector<1x16xf32>
    %10 = vector.shape_cast %9 : vector<1x16xf32> to vector<1x1x16xf32>
    %11 = vector.broadcast %10 : vector<1x1x16xf32> to vector<8x8x16xf32>
    %12 = arith.addf %8, %11 : vector<8x8x16xf32>
    %13 = vector.shape_cast %12 : vector<8x8x16xf32> to vector<64x16xf32>
    %c0_14 = arith.constant 0 : index
    %c0_15 = arith.constant 0 : index
    %14 = vector.load %arg3[%c0_14, %c0_15] : memref<16x96xf32, #tpu.memory_space<vmem>>, vector<16x96xf32>
    %cst = arith.constant dense<0.000000e+00> : vector<64x96xf32>
    %15 = tpu.matmul %13, %14, %cst {dimension_numbers = #tpu.dot_dimension_numbers<[1], [0], [0], [1], [0, 0, 1, 1], [], []>} : vector<64x16xf32>, vector<16x96xf32>, vector<64x96xf32> -> vector<64x96xf32>
    %16 = vector.shape_cast %15 : vector<64x96xf32> to vector<8x8x96xf32>
    %c0_16 = arith.constant 0 : index
    %c0_17 = arith.constant 0 : index
    %17 = vector.load %arg5[%c0_16, %c0_17] : memref<1x96xf32, #tpu.memory_space<vmem>>, vector<1x96xf32>
    %18 = vector.shape_cast %17 : vector<1x96xf32> to vector<1x1x96xf32>
    %19 = vector.broadcast %18 : vector<1x1x96xf32> to vector<8x8x96xf32>
    %20 = arith.addf %16, %19 : vector<8x8x96xf32>
    %c0_18 = arith.constant 0 : index
    %c0_19 = arith.constant 0 : index
    %c0_20 = arith.constant 0 : index
    %21 = vector.load %arg22[%c0_18, %c0_19, %c0_20] : memref<8x8x96xf32, #tpu.memory_space<vmem>>, vector<8x8x96xf32>
    tpu.vector_store %arg22[%c0_18, %c0_19, %c0_20], %20 {strides = array<i32>} : memref<8x8x96xf32, #tpu.memory_space<vmem>>, vector<8x8x96xf32>,
    %cst_21 = arith.constant 0.000000e+00 : f32
    %22 = vector.broadcast %cst_21 : f32 to vector<8x32xf32>
    %cst_22 = arith.constant 0.000000e+00 : f32
    %23 = vector.broadcast %cst_22 : f32 to vector<8x32xf32>
    %cst_23 = arith.constant 0.000000e+00 : f32
    %24 = vector.broadcast %cst_23 : f32 to vector<8x32xf32>
    %c0_i32 = arith.constant 0 : i32
    %25 = arith.index_cast %c0_i32 : i32 to index
    %c0_24 = arith.constant 0 : index
    %c0_25 = arith.constant 0 : index
    %26 = vector.load %arg22[%25, %c0_24, %c0_25] : memref<8x8x96xf32, #tpu.memory_space<vmem>>, vector<1x8x96xf32>
    %27 = vector.shape_cast %26 : vector<1x8x96xf32> to vector<8x96xf32>
    %cst_26 = arith.constant dense<0.000000e+00> : vector<8x96xf32>
    %28 = tpu.matmul %22, %0, %cst_26 {dimension_numbers = #tpu.dot_dimension_numbers<[1], [0], [0], [1], [0, 0, 1, 1], [], []>} : vector<8x32xf32>, vector<32x96xf32>, vector<8x96xf32> -> vector<8x96xf32>
    %29 = vector.broadcast %1 : vector<1x96xf32> to vector<8x96xf32>
    %30 = arith.addf %28, %29 : vector<8x96xf32>
    %31 = arith.addf %27, %30 : vector<8x96xf32>
    %32 = vector.extract_strided_slice %31 {offsets = [0, 0], sizes = [8, 32], strides = [1, 1]} : vector<8x96xf32> to vector<8x32xf32>
    %33 = arith.negf %32 : vector<8x32xf32>
    %34 = math.exp %33 : vector<8x32xf32>
    %cst_27 = arith.constant 1.000000e+00 : f32
    %35 = vector.broadcast %cst_27 : f32 to vector<8x32xf32>
    %36 = arith.addf %35, %34 : vector<8x32xf32>
    %37 = arith.divf %35, %36 : vector<8x32xf32>
    %38 = vector.extract_strided_slice %31 {offsets = [0, 32], sizes = [8, 32], strides = [1, 1]} : vector<8x96xf32> to vector<8x32xf32>
    %39 = arith.negf %38 : vector<8x32xf32>
    %40 = math.exp %39 : vector<8x32xf32>
    %cst_28 = arith.constant 1.000000e+00 : f32
    %41 = vector.broadcast %cst_28 : f32 to vector<8x32xf32>
    %42 = arith.addf %41, %40 : vector<8x32xf32>
    %43 = arith.divf %41, %42 : vector<8x32xf32>
    %44 = vector.extract_strided_slice %27 {offsets = [0, 64], sizes = [8, 32], strides = [1, 1]} : vector<8x96xf32> to vector<8x32xf32>
    %45 = vector.extract_strided_slice %30 {offsets = [0, 64], sizes = [8, 32], strides = [1, 1]} : vector<8x96xf32> to vector<8x32xf32>
    %46 = arith.mulf %37, %45 : vector<8x32xf32>
    %47 = arith.addf %44, %46 : vector<8x32xf32>
    %48 = math.tanh %47 : vector<8x32xf32>
    %cst_29 = arith.constant 1.000000e+00 : f32
    %49 = vector.broadcast %cst_29 : f32 to vector<8x32xf32>
    %50 = arith.subf %49, %43 : vector<8x32xf32>
    %51 = arith.mulf %50, %48 : vector<8x32xf32>
    %52 = arith.mulf %43, %22 : vector<8x32xf32>
    %53 = arith.addf %51, %52 : vector<8x32xf32>
    %54 = tpu.concatenate %53, %23 in 1 : vector<8x32xf32>, vector<8x32xf32> -> vector<8x64xf32>
    %cst_30 = arith.constant dense<0.000000e+00> : vector<8x128xf32>
    %55 = tpu.matmul %54, %2, %cst_30 {dimension_numbers = #tpu.dot_dimension_numbers<[1], [0], [0], [1], [0, 0, 1, 1], [], []>} : vector<8x64xf32>, vector<64x128xf32>, vector<8x128xf32> -> vector<8x128xf32>
    %56 = vector.broadcast %3 : vector<1x128xf32> to vector<8x128xf32>
    %57 = arith.addf %55, %56 : vector<8x128xf32>
    %58 = vector.extract_strided_slice %57 {offsets = [0, 0], sizes = [8, 32], strides = [1, 1]} : vector<8x128xf32> to vector<8x32xf32>
    %59 = arith.negf %58 : vector<8x32xf32>
    %60 = math.exp %59 : vector<8x32xf32>
    %cst_31 = arith.constant 1.000000e+00 : f32
    %61 = vector.broadcast %cst_31 : f32 to vector<8x32xf32>
    %62 = arith.addf %61, %60 : vector<8x32xf32>
    %63 = arith.divf %61, %62 : vector<8x32xf32>
    %64 = vector.extract_strided_slice %57 {offsets = [0, 32], sizes = [8, 32], strides = [1, 1]} : vector<8x128xf32> to vector<8x32xf32>
    %65 = arith.negf %64 : vector<8x32xf32>
    %66 = math.exp %65 : vector<8x32xf32>
    %cst_32 = arith.constant 1.000000e+00 : f32
    %67 = vector.broadcast %cst_32 : f32 to vector<8x32xf32>
    %68 = arith.addf %67, %66 : vector<8x32xf32>
    %69 = arith.divf %67, %68 : vector<8x32xf32>
    %70 = vector.extract_strided_slice %57 {offsets = [0, 64], sizes = [8, 32], strides = [1, 1]} : vector<8x128xf32> to vector<8x32xf32>
    %71 = math.tanh %70 : vector<8x32xf32>
    %72 = vector.extract_strided_slice %57 {offsets = [0, 96], sizes = [8, 32], strides = [1, 1]} : vector<8x128xf32> to vector<8x32xf32>
    %73 = arith.negf %72 : vector<8x32xf32>
    %74 = math.exp %73 : vector<8x32xf32>
    %cst_33 = arith.constant 1.000000e+00 : f32
    %75 = vector.broadcast %cst_33 : f32 to vector<8x32xf32>
    %76 = arith.addf %75, %74 : vector<8x32xf32>
    %77 = arith.divf %75, %76 : vector<8x32xf32>
    %78 = arith.mulf %69, %24 : vector<8x32xf32>
    %79 = arith.mulf %63, %71 : vector<8x32xf32>
    %80 = arith.addf %78, %79 : vector<8x32xf32>
    %81 = math.tanh %80 : vector<8x32xf32>
    %82 = arith.mulf %77, %81 : vector<8x32xf32>
    %83 = arith.index_cast %c0_i32 : i32 to index
    %c0_34 = arith.constant 0 : index
    %c0_35 = arith.constant 0 : index
    %84 = vector.load %arg23[%83, %c0_34, %c0_35] : memref<8x8x32xf32, #tpu.memory_space<vmem>>, vector<1x8x32xf32>
    %85 = vector.shape_cast %84 : vector<1x8x32xf32> to vector<8x32xf32>
    %86 = vector.shape_cast %82 : vector<8x32xf32> to vector<1x8x32xf32>
    tpu.vector_store %arg23[%83, %c0_34, %c0_35], %86 {strides = array<i32>} : memref<8x8x32xf32, #tpu.memory_space<vmem>>, vector<1x8x32xf32>,
    %c1_i32 = arith.constant 1 : i32
    %87 = arith.index_cast %c1_i32 : i32 to index
    %c0_36 = arith.constant 0 : index
    %c0_37 = arith.constant 0 : index
    %88 = vector.load %arg22[%87, %c0_36, %c0_37] : memref<8x8x96xf32, #tpu.memory_space<vmem>>, vector<1x8x96xf32>
    %89 = vector.shape_cast %88 : vector<1x8x96xf32> to vector<8x96xf32>
    %cst_38 = arith.constant dense<0.000000e+00> : vector<8x96xf32>
    %90 = tpu.matmul %53, %0, %cst_38 {dimension_numbers = #tpu.dot_dimension_numbers<[1], [0], [0], [1], [0, 0, 1, 1], [], []>} : vector<8x32xf32>, vector<32x96xf32>, vector<8x96xf32> -> vector<8x96xf32>
    %91 = vector.broadcast %1 : vector<1x96xf32> to vector<8x96xf32>
    %92 = arith.addf %90, %91 : vector<8x96xf32>
    %93 = arith.addf %89, %92 : vector<8x96xf32>
    %94 = vector.extract_strided_slice %93 {offsets = [0, 0], sizes = [8, 32], strides = [1, 1]} : vector<8x96xf32> to vector<8x32xf32>
    %95 = arith.negf %94 : vector<8x32xf32>
    %96 = math.exp %95 : vector<8x32xf32>
    %cst_39 = arith.constant 1.000000e+00 : f32
    %97 = vector.broadcast %cst_39 : f32 to vector<8x32xf32>
    %98 = arith.addf %97, %96 : vector<8x32xf32>
    %99 = arith.divf %97, %98 : vector<8x32xf32>
    %100 = vector.extract_strided_slice %93 {offsets = [0, 32], sizes = [8, 32], strides = [1, 1]} : vector<8x96xf32> to vector<8x32xf32>
    %101 = arith.negf %100 : vector<8x32xf32>
    %102 = math.exp %101 : vector<8x32xf32>
    %cst_40 = arith.constant 1.000000e+00 : f32
    %103 = vector.broadcast %cst_40 : f32 to vector<8x32xf32>
    %104 = arith.addf %103, %102 : vector<8x32xf32>
    %105 = arith.divf %103, %104 : vector<8x32xf32>
    %106 = vector.extract_strided_slice %89 {offsets = [0, 64], sizes = [8, 32], strides = [1, 1]} : vector<8x96xf32> to vector<8x32xf32>
    %107 = vector.extract_strided_slice %92 {offsets = [0, 64], sizes = [8, 32], strides = [1, 1]} : vector<8x96xf32> to vector<8x32xf32>
    %108 = arith.mulf %99, %107 : vector<8x32xf32>
    %109 = arith.addf %106, %108 : vector<8x32xf32>
    %110 = math.tanh %109 : vector<8x32xf32>
    %cst_41 = arith.constant 1.000000e+00 : f32
    %111 = vector.broadcast %cst_41 : f32 to vector<8x32xf32>
    %112 = arith.subf %111, %105 : vector<8x32xf32>
    %113 = arith.mulf %112, %110 : vector<8x32xf32>
    %114 = arith.mulf %105, %53 : vector<8x32xf32>
    %115 = arith.addf %113, %114 : vector<8x32xf32>
    %116 = tpu.concatenate %115, %82 in 1 : vector<8x32xf32>, vector<8x32xf32> -> vector<8x64xf32>
    %cst_42 = arith.constant dense<0.000000e+00> : vector<8x128xf32>
    %117 = tpu.matmul %116, %2, %cst_42 {dimension_numbers = #tpu.dot_dimension_numbers<[1], [0], [0], [1], [0, 0, 1, 1], [], []>} : vector<8x64xf32>, vector<64x128xf32>, vector<8x128xf32> -> vector<8x128xf32>
    %118 = vector.broadcast %3 : vector<1x128xf32> to vector<8x128xf32>
    %119 = arith.addf %117, %118 : vector<8x128xf32>
    %120 = vector.extract_strided_slice %119 {offsets = [0, 0], sizes = [8, 32], strides = [1, 1]} : vector<8x128xf32> to vector<8x32xf32>
    %121 = arith.negf %120 : vector<8x32xf32>
    %122 = math.exp %121 : vector<8x32xf32>
    %cst_43 = arith.constant 1.000000e+00 : f32
    %123 = vector.broadcast %cst_43 : f32 to vector<8x32xf32>
    %124 = arith.addf %123, %122 : vector<8x32xf32>
    %125 = arith.divf %123, %124 : vector<8x32xf32>
    %126 = vector.extract_strided_slice %119 {offsets = [0, 32], sizes = [8, 32], strides = [1, 1]} : vector<8x128xf32> to vector<8x32xf32>
    %127 = arith.negf %126 : vector<8x32xf32>
    %128 = math.exp %127 : vector<8x32xf32>
    %cst_44 = arith.constant 1.000000e+00 : f32
    %129 = vector.broadcast %cst_44 : f32 to vector<8x32xf32>
    %130 = arith.addf %129, %128 : vector<8x32xf32>
    %131 = arith.divf %129, %130 : vector<8x32xf32>
    %132 = vector.extract_strided_slice %119 {offsets = [0, 64], sizes = [8, 32], strides = [1, 1]} : vector<8x128xf32> to vector<8x32xf32>
    %133 = math.tanh %132 : vector<8x32xf32>
    %134 = vector.extract_strided_slice %119 {offsets = [0, 96], sizes = [8, 32], strides = [1, 1]} : vector<8x128xf32> to vector<8x32xf32>
    %135 = arith.negf %134 : vector<8x32xf32>
    %136 = math.exp %135 : vector<8x32xf32>
    %cst_45 = arith.constant 1.000000e+00 : f32
    %137 = vector.broadcast %cst_45 : f32 to vector<8x32xf32>
    %138 = arith.addf %137, %136 : vector<8x32xf32>
    %139 = arith.divf %137, %138 : vector<8x32xf32>
    %140 = arith.mulf %131, %80 : vector<8x32xf32>
    %141 = arith.mulf %125, %133 : vector<8x32xf32>
    %142 = arith.addf %140, %141 : vector<8x32xf32>
    %143 = math.tanh %142 : vector<8x32xf32>
    %144 = arith.mulf %139, %143 : vector<8x32xf32>
    %145 = arith.index_cast %c1_i32 : i32 to index
    %c0_46 = arith.constant 0 : index
    %c0_47 = arith.constant 0 : index
    %146 = vector.load %arg23[%145, %c0_46, %c0_47] : memref<8x8x32xf32, #tpu.memory_space<vmem>>, vector<1x8x32xf32>
    %147 = vector.shape_cast %146 : vector<1x8x32xf32> to vector<8x32xf32>
    %148 = vector.shape_cast %144 : vector<8x32xf32> to vector<1x8x32xf32>
    tpu.vector_store %arg23[%145, %c0_46, %c0_47], %148 {strides = array<i32>} : memref<8x8x32xf32, #tpu.memory_space<vmem>>, vector<1x8x32xf32>,
    %c2_i32 = arith.constant 2 : i32
    %149 = arith.index_cast %c2_i32 : i32 to index
    %c0_48 = arith.constant 0 : index
    %c0_49 = arith.constant 0 : index
    %150 = vector.load %arg22[%149, %c0_48, %c0_49] : memref<8x8x96xf32, #tpu.memory_space<vmem>>, vector<1x8x96xf32>
    %151 = vector.shape_cast %150 : vector<1x8x96xf32> to vector<8x96xf32>
    %cst_50 = arith.constant dense<0.000000e+00> : vector<8x96xf32>
    %152 = tpu.matmul %115, %0, %cst_50 {dimension_numbers = #tpu.dot_dimension_numbers<[1], [0], [0], [1], [0, 0, 1, 1], [], []>} : vector<8x32xf32>, vector<32x96xf32>, vector<8x96xf32> -> vector<8x96xf32>
    %153 = vector.broadcast %1 : vector<1x96xf32> to vector<8x96xf32>
    %154 = arith.addf %152, %153 : vector<8x96xf32>
    %155 = arith.addf %151, %154 : vector<8x96xf32>
    %156 = vector.extract_strided_slice %155 {offsets = [0, 0], sizes = [8, 32], strides = [1, 1]} : vector<8x96xf32> to vector<8x32xf32>
    %157 = arith.negf %156 : vector<8x32xf32>
    %158 = math.exp %157 : vector<8x32xf32>
    %cst_51 = arith.constant 1.000000e+00 : f32
    %159 = vector.broadcast %cst_51 : f32 to vector<8x32xf32>
    %160 = arith.addf %159, %158 : vector<8x32xf32>
    %161 = arith.divf %159, %160 : vector<8x32xf32>
    %162 = vector.extract_strided_slice %155 {offsets = [0, 32], sizes = [8, 32], strides = [1, 1]} : vector<8x96xf32> to vector<8x32xf32>
    %163 = arith.negf %162 : vector<8x32xf32>
    %164 = math.exp %163 : vector<8x32xf32>
    %cst_52 = arith.constant 1.000000e+00 : f32
    %165 = vector.broadcast %cst_52 : f32 to vector<8x32xf32>
    %166 = arith.addf %165, %164 : vector<8x32xf32>
    %167 = arith.divf %165, %166 : vector<8x32xf32>
    %168 = vector.extract_strided_slice %151 {offsets = [0, 64], sizes = [8, 32], strides = [1, 1]} : vector<8x96xf32> to vector<8x32xf32>
    %169 = vector.extract_strided_slice %154 {offsets = [0, 64], sizes = [8, 32], strides = [1, 1]} : vector<8x96xf32> to vector<8x32xf32>
    %170 = arith.mulf %161, %169 : vector<8x32xf32>
    %171 = arith.addf %168, %170 : vector<8x32xf32>
    %172 = math.tanh %171 : vector<8x32xf32>
    %cst_53 = arith.constant 1.000000e+00 : f32
    %173 = vector.broadcast %cst_53 : f32 to vector<8x32xf32>
    %174 = arith.subf %173, %167 : vector<8x32xf32>
    %175 = arith.mulf %174, %172 : vector<8x32xf32>
    %176 = arith.mulf %167, %115 : vector<8x32xf32>
    %177 = arith.addf %175, %176 : vector<8x32xf32>
    %178 = tpu.concatenate %177, %144 in 1 : vector<8x32xf32>, vector<8x32xf32> -> vector<8x64xf32>
    %cst_54 = arith.constant dense<0.000000e+00> : vector<8x128xf32>
    %179 = tpu.matmul %178, %2, %cst_54 {dimension_numbers = #tpu.dot_dimension_numbers<[1], [0], [0], [1], [0, 0, 1, 1], [], []>} : vector<8x64xf32>, vector<64x128xf32>, vector<8x128xf32> -> vector<8x128xf32>
    %180 = vector.broadcast %3 : vector<1x128xf32> to vector<8x128xf32>
    %181 = arith.addf %179, %180 : vector<8x128xf32>
    %182 = vector.extract_strided_slice %181 {offsets = [0, 0], sizes = [8, 32], strides = [1, 1]} : vector<8x128xf32> to vector<8x32xf32>
    %183 = arith.negf %182 : vector<8x32xf32>
    %184 = math.exp %183 : vector<8x32xf32>
    %cst_55 = arith.constant 1.000000e+00 : f32
    %185 = vector.broadcast %cst_55 : f32 to vector<8x32xf32>
    %186 = arith.addf %185, %184 : vector<8x32xf32>
    %187 = arith.divf %185, %186 : vector<8x32xf32>
    %188 = vector.extract_strided_slice %181 {offsets = [0, 32], sizes = [8, 32], strides = [1, 1]} : vector<8x128xf32> to vector<8x32xf32>
    %189 = arith.negf %188 : vector<8x32xf32>
    %190 = math.exp %189 : vector<8x32xf32>
    %cst_56 = arith.constant 1.000000e+00 : f32
    %191 = vector.broadcast %cst_56 : f32 to vector<8x32xf32>
    %192 = arith.addf %191, %190 : vector<8x32xf32>
    %193 = arith.divf %191, %192 : vector<8x32xf32>
    %194 = vector.extract_strided_slice %181 {offsets = [0, 64], sizes = [8, 32], strides = [1, 1]} : vector<8x128xf32> to vector<8x32xf32>
    %195 = math.tanh %194 : vector<8x32xf32>
    %196 = vector.extract_strided_slice %181 {offsets = [0, 96], sizes = [8, 32], strides = [1, 1]} : vector<8x128xf32> to vector<8x32xf32>
    %197 = arith.negf %196 : vector<8x32xf32>
    %198 = math.exp %197 : vector<8x32xf32>
    %cst_57 = arith.constant 1.000000e+00 : f32
    %199 = vector.broadcast %cst_57 : f32 to vector<8x32xf32>
    %200 = arith.addf %199, %198 : vector<8x32xf32>
    %201 = arith.divf %199, %200 : vector<8x32xf32>
    %202 = arith.mulf %193, %142 : vector<8x32xf32>
    %203 = arith.mulf %187, %195 : vector<8x32xf32>
    %204 = arith.addf %202, %203 : vector<8x32xf32>
    %205 = math.tanh %204 : vector<8x32xf32>
    %206 = arith.mulf %201, %205 : vector<8x32xf32>
    %207 = arith.index_cast %c2_i32 : i32 to index
    %c0_58 = arith.constant 0 : index
    %c0_59 = arith.constant 0 : index
    %208 = vector.load %arg23[%207, %c0_58, %c0_59] : memref<8x8x32xf32, #tpu.memory_space<vmem>>, vector<1x8x32xf32>
    %209 = vector.shape_cast %208 : vector<1x8x32xf32> to vector<8x32xf32>
    %210 = vector.shape_cast %206 : vector<8x32xf32> to vector<1x8x32xf32>
    tpu.vector_store %arg23[%207, %c0_58, %c0_59], %210 {strides = array<i32>} : memref<8x8x32xf32, #tpu.memory_space<vmem>>, vector<1x8x32xf32>,
    %c3_i32 = arith.constant 3 : i32
    %211 = arith.index_cast %c3_i32 : i32 to index
    %c0_60 = arith.constant 0 : index
    %c0_61 = arith.constant 0 : index
    %212 = vector.load %arg22[%211, %c0_60, %c0_61] : memref<8x8x96xf32, #tpu.memory_space<vmem>>, vector<1x8x96xf32>
    %213 = vector.shape_cast %212 : vector<1x8x96xf32> to vector<8x96xf32>
    %cst_62 = arith.constant dense<0.000000e+00> : vector<8x96xf32>
    %214 = tpu.matmul %177, %0, %cst_62 {dimension_numbers = #tpu.dot_dimension_numbers<[1], [0], [0], [1], [0, 0, 1, 1], [], []>} : vector<8x32xf32>, vector<32x96xf32>, vector<8x96xf32> -> vector<8x96xf32>
    %215 = vector.broadcast %1 : vector<1x96xf32> to vector<8x96xf32>
    %216 = arith.addf %214, %215 : vector<8x96xf32>
    %217 = arith.addf %213, %216 : vector<8x96xf32>
    %218 = vector.extract_strided_slice %217 {offsets = [0, 0], sizes = [8, 32], strides = [1, 1]} : vector<8x96xf32> to vector<8x32xf32>
    %219 = arith.negf %218 : vector<8x32xf32>
    %220 = math.exp %219 : vector<8x32xf32>
    %cst_63 = arith.constant 1.000000e+00 : f32
    %221 = vector.broadcast %cst_63 : f32 to vector<8x32xf32>
    %222 = arith.addf %221, %220 : vector<8x32xf32>
    %223 = arith.divf %221, %222 : vector<8x32xf32>
    %224 = vector.extract_strided_slice %217 {offsets = [0, 32], sizes = [8, 32], strides = [1, 1]} : vector<8x96xf32> to vector<8x32xf32>
    %225 = arith.negf %224 : vector<8x32xf32>
    %226 = math.exp %225 : vector<8x32xf32>
    %cst_64 = arith.constant 1.000000e+00 : f32
    %227 = vector.broadcast %cst_64 : f32 to vector<8x32xf32>
    %228 = arith.addf %227, %226 : vector<8x32xf32>
    %229 = arith.divf %227, %228 : vector<8x32xf32>
    %230 = vector.extract_strided_slice %213 {offsets = [0, 64], sizes = [8, 32], strides = [1, 1]} : vector<8x96xf32> to vector<8x32xf32>
    %231 = vector.extract_strided_slice %216 {offsets = [0, 64], sizes = [8, 32], strides = [1, 1]} : vector<8x96xf32> to vector<8x32xf32>
    %232 = arith.mulf %223, %231 : vector<8x32xf32>
    %233 = arith.addf %230, %232 : vector<8x32xf32>
    %234 = math.tanh %233 : vector<8x32xf32>
    %cst_65 = arith.constant 1.000000e+00 : f32
    %235 = vector.broadcast %cst_65 : f32 to vector<8x32xf32>
    %236 = arith.subf %235, %229 : vector<8x32xf32>
    %237 = arith.mulf %236, %234 : vector<8x32xf32>
    %238 = arith.mulf %229, %177 : vector<8x32xf32>
    %239 = arith.addf %237, %238 : vector<8x32xf32>
    %240 = tpu.concatenate %239, %206 in 1 : vector<8x32xf32>, vector<8x32xf32> -> vector<8x64xf32>
    %cst_66 = arith.constant dense<0.000000e+00> : vector<8x128xf32>
    %241 = tpu.matmul %240, %2, %cst_66 {dimension_numbers = #tpu.dot_dimension_numbers<[1], [0], [0], [1], [0, 0, 1, 1], [], []>} : vector<8x64xf32>, vector<64x128xf32>, vector<8x128xf32> -> vector<8x128xf32>
    %242 = vector.broadcast %3 : vector<1x128xf32> to vector<8x128xf32>
    %243 = arith.addf %241, %242 : vector<8x128xf32>
    %244 = vector.extract_strided_slice %243 {offsets = [0, 0], sizes = [8, 32], strides = [1, 1]} : vector<8x128xf32> to vector<8x32xf32>
    %245 = arith.negf %244 : vector<8x32xf32>
    %246 = math.exp %245 : vector<8x32xf32>
    %cst_67 = arith.constant 1.000000e+00 : f32
    %247 = vector.broadcast %cst_67 : f32 to vector<8x32xf32>
    %248 = arith.addf %247, %246 : vector<8x32xf32>
    %249 = arith.divf %247, %248 : vector<8x32xf32>
    %250 = vector.extract_strided_slice %243 {offsets = [0, 32], sizes = [8, 32], strides = [1, 1]} : vector<8x128xf32> to vector<8x32xf32>
    %251 = arith.negf %250 : vector<8x32xf32>
    %252 = math.exp %251 : vector<8x32xf32>
    %cst_68 = arith.constant 1.000000e+00 : f32
    %253 = vector.broadcast %cst_68 : f32 to vector<8x32xf32>
    %254 = arith.addf %253, %252 : vector<8x32xf32>
    %255 = arith.divf %253, %254 : vector<8x32xf32>
    %256 = vector.extract_strided_slice %243 {offsets = [0, 64], sizes = [8, 32], strides = [1, 1]} : vector<8x128xf32> to vector<8x32xf32>
    %257 = math.tanh %256 : vector<8x32xf32>
    %258 = vector.extract_strided_slice %243 {offsets = [0, 96], sizes = [8, 32], strides = [1, 1]} : vector<8x128xf32> to vector<8x32xf32>
    %259 = arith.negf %258 : vector<8x32xf32>
    %260 = math.exp %259 : vector<8x32xf32>
    %cst_69 = arith.constant 1.000000e+00 : f32
    %261 = vector.broadcast %cst_69 : f32 to vector<8x32xf32>
    %262 = arith.addf %261, %260 : vector<8x32xf32>
    %263 = arith.divf %261, %262 : vector<8x32xf32>
    %264 = arith.mulf %255, %204 : vector<8x32xf32>
    %265 = arith.mulf %249, %257 : vector<8x32xf32>
    %266 = arith.addf %264, %265 : vector<8x32xf32>
    %267 = math.tanh %266 : vector<8x32xf32>
    %268 = arith.mulf %263, %267 : vector<8x32xf32>
    %269 = arith.index_cast %c3_i32 : i32 to index
    %c0_70 = arith.constant 0 : index
    %c0_71 = arith.constant 0 : index
    %270 = vector.load %arg23[%269, %c0_70, %c0_71] : memref<8x8x32xf32, #tpu.memory_space<vmem>>, vector<1x8x32xf32>
    %271 = vector.shape_cast %270 : vector<1x8x32xf32> to vector<8x32xf32>
    %272 = vector.shape_cast %268 : vector<8x32xf32> to vector<1x8x32xf32>
    tpu.vector_store %arg23[%269, %c0_70, %c0_71], %272 {strides = array<i32>} : memref<8x8x32xf32, #tpu.memory_space<vmem>>, vector<1x8x32xf32>,
    %c4_i32 = arith.constant 4 : i32
    %273 = arith.index_cast %c4_i32 : i32 to index
    %c0_72 = arith.constant 0 : index
    %c0_73 = arith.constant 0 : index
    %274 = vector.load %arg22[%273, %c0_72, %c0_73] : memref<8x8x96xf32, #tpu.memory_space<vmem>>, vector<1x8x96xf32>
    %275 = vector.shape_cast %274 : vector<1x8x96xf32> to vector<8x96xf32>
    %cst_74 = arith.constant dense<0.000000e+00> : vector<8x96xf32>
    %276 = tpu.matmul %239, %0, %cst_74 {dimension_numbers = #tpu.dot_dimension_numbers<[1], [0], [0], [1], [0, 0, 1, 1], [], []>} : vector<8x32xf32>, vector<32x96xf32>, vector<8x96xf32> -> vector<8x96xf32>
    %277 = vector.broadcast %1 : vector<1x96xf32> to vector<8x96xf32>
    %278 = arith.addf %276, %277 : vector<8x96xf32>
    %279 = arith.addf %275, %278 : vector<8x96xf32>
    %280 = vector.extract_strided_slice %279 {offsets = [0, 0], sizes = [8, 32], strides = [1, 1]} : vector<8x96xf32> to vector<8x32xf32>
    %281 = arith.negf %280 : vector<8x32xf32>
    %282 = math.exp %281 : vector<8x32xf32>
    %cst_75 = arith.constant 1.000000e+00 : f32
    %283 = vector.broadcast %cst_75 : f32 to vector<8x32xf32>
    %284 = arith.addf %283, %282 : vector<8x32xf32>
    %285 = arith.divf %283, %284 : vector<8x32xf32>
    %286 = vector.extract_strided_slice %279 {offsets = [0, 32], sizes = [8, 32], strides = [1, 1]} : vector<8x96xf32> to vector<8x32xf32>
    %287 = arith.negf %286 : vector<8x32xf32>
    %288 = math.exp %287 : vector<8x32xf32>
    %cst_76 = arith.constant 1.000000e+00 : f32
    %289 = vector.broadcast %cst_76 : f32 to vector<8x32xf32>
    %290 = arith.addf %289, %288 : vector<8x32xf32>
    %291 = arith.divf %289, %290 : vector<8x32xf32>
    %292 = vector.extract_strided_slice %275 {offsets = [0, 64], sizes = [8, 32], strides = [1, 1]} : vector<8x96xf32> to vector<8x32xf32>
    %293 = vector.extract_strided_slice %278 {offsets = [0, 64], sizes = [8, 32], strides = [1, 1]} : vector<8x96xf32> to vector<8x32xf32>
    %294 = arith.mulf %285, %293 : vector<8x32xf32>
    %295 = arith.addf %292, %294 : vector<8x32xf32>
    %296 = math.tanh %295 : vector<8x32xf32>
    %cst_77 = arith.constant 1.000000e+00 : f32
    %297 = vector.broadcast %cst_77 : f32 to vector<8x32xf32>
    %298 = arith.subf %297, %291 : vector<8x32xf32>
    %299 = arith.mulf %298, %296 : vector<8x32xf32>
    %300 = arith.mulf %291, %239 : vector<8x32xf32>
    %301 = arith.addf %299, %300 : vector<8x32xf32>
    %302 = tpu.concatenate %301, %268 in 1 : vector<8x32xf32>, vector<8x32xf32> -> vector<8x64xf32>
    %cst_78 = arith.constant dense<0.000000e+00> : vector<8x128xf32>
    %303 = tpu.matmul %302, %2, %cst_78 {dimension_numbers = #tpu.dot_dimension_numbers<[1], [0], [0], [1], [0, 0, 1, 1], [], []>} : vector<8x64xf32>, vector<64x128xf32>, vector<8x128xf32> -> vector<8x128xf32>
    %304 = vector.broadcast %3 : vector<1x128xf32> to vector<8x128xf32>
    %305 = arith.addf %303, %304 : vector<8x128xf32>
    %306 = vector.extract_strided_slice %305 {offsets = [0, 0], sizes = [8, 32], strides = [1, 1]} : vector<8x128xf32> to vector<8x32xf32>
    %307 = arith.negf %306 : vector<8x32xf32>
    %308 = math.exp %307 : vector<8x32xf32>
    %cst_79 = arith.constant 1.000000e+00 : f32
    %309 = vector.broadcast %cst_79 : f32 to vector<8x32xf32>
    %310 = arith.addf %309, %308 : vector<8x32xf32>
    %311 = arith.divf %309, %310 : vector<8x32xf32>
    %312 = vector.extract_strided_slice %305 {offsets = [0, 32], sizes = [8, 32], strides = [1, 1]} : vector<8x128xf32> to vector<8x32xf32>
    %313 = arith.negf %312 : vector<8x32xf32>
    %314 = math.exp %313 : vector<8x32xf32>
    %cst_80 = arith.constant 1.000000e+00 : f32
    %315 = vector.broadcast %cst_80 : f32 to vector<8x32xf32>
    %316 = arith.addf %315, %314 : vector<8x32xf32>
    %317 = arith.divf %315, %316 : vector<8x32xf32>
    %318 = vector.extract_strided_slice %305 {offsets = [0, 64], sizes = [8, 32], strides = [1, 1]} : vector<8x128xf32> to vector<8x32xf32>
    %319 = math.tanh %318 : vector<8x32xf32>
    %320 = vector.extract_strided_slice %305 {offsets = [0, 96], sizes = [8, 32], strides = [1, 1]} : vector<8x128xf32> to vector<8x32xf32>
    %321 = arith.negf %320 : vector<8x32xf32>
    %322 = math.exp %321 : vector<8x32xf32>
    %cst_81 = arith.constant 1.000000e+00 : f32
    %323 = vector.broadcast %cst_81 : f32 to vector<8x32xf32>
    %324 = arith.addf %323, %322 : vector<8x32xf32>
    %325 = arith.divf %323, %324 : vector<8x32xf32>
    %326 = arith.mulf %317, %266 : vector<8x32xf32>
    %327 = arith.mulf %311, %319 : vector<8x32xf32>
    %328 = arith.addf %326, %327 : vector<8x32xf32>
    %329 = math.tanh %328 : vector<8x32xf32>
    %330 = arith.mulf %325, %329 : vector<8x32xf32>
    %331 = arith.index_cast %c4_i32 : i32 to index
    %c0_82 = arith.constant 0 : index
    %c0_83 = arith.constant 0 : index
    %332 = vector.load %arg23[%331, %c0_82, %c0_83] : memref<8x8x32xf32, #tpu.memory_space<vmem>>, vector<1x8x32xf32>
    %333 = vector.shape_cast %332 : vector<1x8x32xf32> to vector<8x32xf32>
    %334 = vector.shape_cast %330 : vector<8x32xf32> to vector<1x8x32xf32>
    tpu.vector_store %arg23[%331, %c0_82, %c0_83], %334 {strides = array<i32>} : memref<8x8x32xf32, #tpu.memory_space<vmem>>, vector<1x8x32xf32>,
    %c5_i32 = arith.constant 5 : i32
    %335 = arith.index_cast %c5_i32 : i32 to index
    %c0_84 = arith.constant 0 : index
    %c0_85 = arith.constant 0 : index
    %336 = vector.load %arg22[%335, %c0_84, %c0_85] : memref<8x8x96xf32, #tpu.memory_space<vmem>>, vector<1x8x96xf32>
    %337 = vector.shape_cast %336 : vector<1x8x96xf32> to vector<8x96xf32>
    %cst_86 = arith.constant dense<0.000000e+00> : vector<8x96xf32>
    %338 = tpu.matmul %301, %0, %cst_86 {dimension_numbers = #tpu.dot_dimension_numbers<[1], [0], [0], [1], [0, 0, 1, 1], [], []>} : vector<8x32xf32>, vector<32x96xf32>, vector<8x96xf32> -> vector<8x96xf32>
    %339 = vector.broadcast %1 : vector<1x96xf32> to vector<8x96xf32>
    %340 = arith.addf %338, %339 : vector<8x96xf32>
    %341 = arith.addf %337, %340 : vector<8x96xf32>
    %342 = vector.extract_strided_slice %341 {offsets = [0, 0], sizes = [8, 32], strides = [1, 1]} : vector<8x96xf32> to vector<8x32xf32>
    %343 = arith.negf %342 : vector<8x32xf32>
    %344 = math.exp %343 : vector<8x32xf32>
    %cst_87 = arith.constant 1.000000e+00 : f32
    %345 = vector.broadcast %cst_87 : f32 to vector<8x32xf32>
    %346 = arith.addf %345, %344 : vector<8x32xf32>
    %347 = arith.divf %345, %346 : vector<8x32xf32>
    %348 = vector.extract_strided_slice %341 {offsets = [0, 32], sizes = [8, 32], strides = [1, 1]} : vector<8x96xf32> to vector<8x32xf32>
    %349 = arith.negf %348 : vector<8x32xf32>
    %350 = math.exp %349 : vector<8x32xf32>
    %cst_88 = arith.constant 1.000000e+00 : f32
    %351 = vector.broadcast %cst_88 : f32 to vector<8x32xf32>
    %352 = arith.addf %351, %350 : vector<8x32xf32>
    %353 = arith.divf %351, %352 : vector<8x32xf32>
    %354 = vector.extract_strided_slice %337 {offsets = [0, 64], sizes = [8, 32], strides = [1, 1]} : vector<8x96xf32> to vector<8x32xf32>
    %355 = vector.extract_strided_slice %340 {offsets = [0, 64], sizes = [8, 32], strides = [1, 1]} : vector<8x96xf32> to vector<8x32xf32>
    %356 = arith.mulf %347, %355 : vector<8x32xf32>
    %357 = arith.addf %354, %356 : vector<8x32xf32>
    %358 = math.tanh %357 : vector<8x32xf32>
    %cst_89 = arith.constant 1.000000e+00 : f32
    %359 = vector.broadcast %cst_89 : f32 to vector<8x32xf32>
    %360 = arith.subf %359, %353 : vector<8x32xf32>
    %361 = arith.mulf %360, %358 : vector<8x32xf32>
    %362 = arith.mulf %353, %301 : vector<8x32xf32>
    %363 = arith.addf %361, %362 : vector<8x32xf32>
    %364 = tpu.concatenate %363, %330 in 1 : vector<8x32xf32>, vector<8x32xf32> -> vector<8x64xf32>
    %cst_90 = arith.constant dense<0.000000e+00> : vector<8x128xf32>
    %365 = tpu.matmul %364, %2, %cst_90 {dimension_numbers = #tpu.dot_dimension_numbers<[1], [0], [0], [1], [0, 0, 1, 1], [], []>} : vector<8x64xf32>, vector<64x128xf32>, vector<8x128xf32> -> vector<8x128xf32>
    %366 = vector.broadcast %3 : vector<1x128xf32> to vector<8x128xf32>
    %367 = arith.addf %365, %366 : vector<8x128xf32>
    %368 = vector.extract_strided_slice %367 {offsets = [0, 0], sizes = [8, 32], strides = [1, 1]} : vector<8x128xf32> to vector<8x32xf32>
    %369 = arith.negf %368 : vector<8x32xf32>
    %370 = math.exp %369 : vector<8x32xf32>
    %cst_91 = arith.constant 1.000000e+00 : f32
    %371 = vector.broadcast %cst_91 : f32 to vector<8x32xf32>
    %372 = arith.addf %371, %370 : vector<8x32xf32>
    %373 = arith.divf %371, %372 : vector<8x32xf32>
    %374 = vector.extract_strided_slice %367 {offsets = [0, 32], sizes = [8, 32], strides = [1, 1]} : vector<8x128xf32> to vector<8x32xf32>
    %375 = arith.negf %374 : vector<8x32xf32>
    %376 = math.exp %375 : vector<8x32xf32>
    %cst_92 = arith.constant 1.000000e+00 : f32
    %377 = vector.broadcast %cst_92 : f32 to vector<8x32xf32>
    %378 = arith.addf %377, %376 : vector<8x32xf32>
    %379 = arith.divf %377, %378 : vector<8x32xf32>
    %380 = vector.extract_strided_slice %367 {offsets = [0, 64], sizes = [8, 32], strides = [1, 1]} : vector<8x128xf32> to vector<8x32xf32>
    %381 = math.tanh %380 : vector<8x32xf32>
    %382 = vector.extract_strided_slice %367 {offsets = [0, 96], sizes = [8, 32], strides = [1, 1]} : vector<8x128xf32> to vector<8x32xf32>
    %383 = arith.negf %382 : vector<8x32xf32>
    %384 = math.exp %383 : vector<8x32xf32>
    %cst_93 = arith.constant 1.000000e+00 : f32
    %385 = vector.broadcast %cst_93 : f32 to vector<8x32xf32>
    %386 = arith.addf %385, %384 : vector<8x32xf32>
    %387 = arith.divf %385, %386 : vector<8x32xf32>
    %388 = arith.mulf %379, %328 : vector<8x32xf32>
    %389 = arith.mulf %373, %381 : vector<8x32xf32>
    %390 = arith.addf %388, %389 : vector<8x32xf32>
    %391 = math.tanh %390 : vector<8x32xf32>
    %392 = arith.mulf %387, %391 : vector<8x32xf32>
    %393 = arith.index_cast %c5_i32 : i32 to index
    %c0_94 = arith.constant 0 : index
    %c0_95 = arith.constant 0 : index
    %394 = vector.load %arg23[%393, %c0_94, %c0_95] : memref<8x8x32xf32, #tpu.memory_space<vmem>>, vector<1x8x32xf32>
    %395 = vector.shape_cast %394 : vector<1x8x32xf32> to vector<8x32xf32>
    %396 = vector.shape_cast %392 : vector<8x32xf32> to vector<1x8x32xf32>
    tpu.vector_store %arg23[%393, %c0_94, %c0_95], %396 {strides = array<i32>} : memref<8x8x32xf32, #tpu.memory_space<vmem>>, vector<1x8x32xf32>,
    %c6_i32 = arith.constant 6 : i32
    %397 = arith.index_cast %c6_i32 : i32 to index
    %c0_96 = arith.constant 0 : index
    %c0_97 = arith.constant 0 : index
    %398 = vector.load %arg22[%397, %c0_96, %c0_97] : memref<8x8x96xf32, #tpu.memory_space<vmem>>, vector<1x8x96xf32>
    %399 = vector.shape_cast %398 : vector<1x8x96xf32> to vector<8x96xf32>
    %cst_98 = arith.constant dense<0.000000e+00> : vector<8x96xf32>
    %400 = tpu.matmul %363, %0, %cst_98 {dimension_numbers = #tpu.dot_dimension_numbers<[1], [0], [0], [1], [0, 0, 1, 1], [], []>} : vector<8x32xf32>, vector<32x96xf32>, vector<8x96xf32> -> vector<8x96xf32>
    %401 = vector.broadcast %1 : vector<1x96xf32> to vector<8x96xf32>
    %402 = arith.addf %400, %401 : vector<8x96xf32>
    %403 = arith.addf %399, %402 : vector<8x96xf32>
    %404 = vector.extract_strided_slice %403 {offsets = [0, 0], sizes = [8, 32], strides = [1, 1]} : vector<8x96xf32> to vector<8x32xf32>
    %405 = arith.negf %404 : vector<8x32xf32>
    %406 = math.exp %405 : vector<8x32xf32>
    %cst_99 = arith.constant 1.000000e+00 : f32
    %407 = vector.broadcast %cst_99 : f32 to vector<8x32xf32>
    %408 = arith.addf %407, %406 : vector<8x32xf32>
    %409 = arith.divf %407, %408 : vector<8x32xf32>
    %410 = vector.extract_strided_slice %403 {offsets = [0, 32], sizes = [8, 32], strides = [1, 1]} : vector<8x96xf32> to vector<8x32xf32>
    %411 = arith.negf %410 : vector<8x32xf32>
    %412 = math.exp %411 : vector<8x32xf32>
    %cst_100 = arith.constant 1.000000e+00 : f32
    %413 = vector.broadcast %cst_100 : f32 to vector<8x32xf32>
    %414 = arith.addf %413, %412 : vector<8x32xf32>
    %415 = arith.divf %413, %414 : vector<8x32xf32>
    %416 = vector.extract_strided_slice %399 {offsets = [0, 64], sizes = [8, 32], strides = [1, 1]} : vector<8x96xf32> to vector<8x32xf32>
    %417 = vector.extract_strided_slice %402 {offsets = [0, 64], sizes = [8, 32], strides = [1, 1]} : vector<8x96xf32> to vector<8x32xf32>
    %418 = arith.mulf %409, %417 : vector<8x32xf32>
    %419 = arith.addf %416, %418 : vector<8x32xf32>
    %420 = math.tanh %419 : vector<8x32xf32>
    %cst_101 = arith.constant 1.000000e+00 : f32
    %421 = vector.broadcast %cst_101 : f32 to vector<8x32xf32>
    %422 = arith.subf %421, %415 : vector<8x32xf32>
    %423 = arith.mulf %422, %420 : vector<8x32xf32>
    %424 = arith.mulf %415, %363 : vector<8x32xf32>
    %425 = arith.addf %423, %424 : vector<8x32xf32>
    %426 = tpu.concatenate %425, %392 in 1 : vector<8x32xf32>, vector<8x32xf32> -> vector<8x64xf32>
    %cst_102 = arith.constant dense<0.000000e+00> : vector<8x128xf32>
    %427 = tpu.matmul %426, %2, %cst_102 {dimension_numbers = #tpu.dot_dimension_numbers<[1], [0], [0], [1], [0, 0, 1, 1], [], []>} : vector<8x64xf32>, vector<64x128xf32>, vector<8x128xf32> -> vector<8x128xf32>
    %428 = vector.broadcast %3 : vector<1x128xf32> to vector<8x128xf32>
    %429 = arith.addf %427, %428 : vector<8x128xf32>
    %430 = vector.extract_strided_slice %429 {offsets = [0, 0], sizes = [8, 32], strides = [1, 1]} : vector<8x128xf32> to vector<8x32xf32>
    %431 = arith.negf %430 : vector<8x32xf32>
    %432 = math.exp %431 : vector<8x32xf32>
    %cst_103 = arith.constant 1.000000e+00 : f32
    %433 = vector.broadcast %cst_103 : f32 to vector<8x32xf32>
    %434 = arith.addf %433, %432 : vector<8x32xf32>
    %435 = arith.divf %433, %434 : vector<8x32xf32>
    %436 = vector.extract_strided_slice %429 {offsets = [0, 32], sizes = [8, 32], strides = [1, 1]} : vector<8x128xf32> to vector<8x32xf32>
    %437 = arith.negf %436 : vector<8x32xf32>
    %438 = math.exp %437 : vector<8x32xf32>
    %cst_104 = arith.constant 1.000000e+00 : f32
    %439 = vector.broadcast %cst_104 : f32 to vector<8x32xf32>
    %440 = arith.addf %439, %438 : vector<8x32xf32>
    %441 = arith.divf %439, %440 : vector<8x32xf32>
    %442 = vector.extract_strided_slice %429 {offsets = [0, 64], sizes = [8, 32], strides = [1, 1]} : vector<8x128xf32> to vector<8x32xf32>
    %443 = math.tanh %442 : vector<8x32xf32>
    %444 = vector.extract_strided_slice %429 {offsets = [0, 96], sizes = [8, 32], strides = [1, 1]} : vector<8x128xf32> to vector<8x32xf32>
    %445 = arith.negf %444 : vector<8x32xf32>
    %446 = math.exp %445 : vector<8x32xf32>
    %cst_105 = arith.constant 1.000000e+00 : f32
    %447 = vector.broadcast %cst_105 : f32 to vector<8x32xf32>
    %448 = arith.addf %447, %446 : vector<8x32xf32>
    %449 = arith.divf %447, %448 : vector<8x32xf32>
    %450 = arith.mulf %441, %390 : vector<8x32xf32>
    %451 = arith.mulf %435, %443 : vector<8x32xf32>
    %452 = arith.addf %450, %451 : vector<8x32xf32>
    %453 = math.tanh %452 : vector<8x32xf32>
    %454 = arith.mulf %449, %453 : vector<8x32xf32>
    %455 = arith.index_cast %c6_i32 : i32 to index
    %c0_106 = arith.constant 0 : index
    %c0_107 = arith.constant 0 : index
    %456 = vector.load %arg23[%455, %c0_106, %c0_107] : memref<8x8x32xf32, #tpu.memory_space<vmem>>, vector<1x8x32xf32>
    %457 = vector.shape_cast %456 : vector<1x8x32xf32> to vector<8x32xf32>
    %458 = vector.shape_cast %454 : vector<8x32xf32> to vector<1x8x32xf32>
    tpu.vector_store %arg23[%455, %c0_106, %c0_107], %458 {strides = array<i32>} : memref<8x8x32xf32, #tpu.memory_space<vmem>>, vector<1x8x32xf32>,
    %c7_i32 = arith.constant 7 : i32
    %459 = arith.index_cast %c7_i32 : i32 to index
    %c0_108 = arith.constant 0 : index
    %c0_109 = arith.constant 0 : index
    %460 = vector.load %arg22[%459, %c0_108, %c0_109] : memref<8x8x96xf32, #tpu.memory_space<vmem>>, vector<1x8x96xf32>
    %461 = vector.shape_cast %460 : vector<1x8x96xf32> to vector<8x96xf32>
    %cst_110 = arith.constant dense<0.000000e+00> : vector<8x96xf32>
    %462 = tpu.matmul %425, %0, %cst_110 {dimension_numbers = #tpu.dot_dimension_numbers<[1], [0], [0], [1], [0, 0, 1, 1], [], []>} : vector<8x32xf32>, vector<32x96xf32>, vector<8x96xf32> -> vector<8x96xf32>
    %463 = vector.broadcast %1 : vector<1x96xf32> to vector<8x96xf32>
    %464 = arith.addf %462, %463 : vector<8x96xf32>
    %465 = arith.addf %461, %464 : vector<8x96xf32>
    %466 = vector.extract_strided_slice %465 {offsets = [0, 0], sizes = [8, 32], strides = [1, 1]} : vector<8x96xf32> to vector<8x32xf32>
    %467 = arith.negf %466 : vector<8x32xf32>
    %468 = math.exp %467 : vector<8x32xf32>
    %cst_111 = arith.constant 1.000000e+00 : f32
    %469 = vector.broadcast %cst_111 : f32 to vector<8x32xf32>
    %470 = arith.addf %469, %468 : vector<8x32xf32>
    %471 = arith.divf %469, %470 : vector<8x32xf32>
    %472 = vector.extract_strided_slice %465 {offsets = [0, 32], sizes = [8, 32], strides = [1, 1]} : vector<8x96xf32> to vector<8x32xf32>
    %473 = arith.negf %472 : vector<8x32xf32>
    %474 = math.exp %473 : vector<8x32xf32>
    %cst_112 = arith.constant 1.000000e+00 : f32
    %475 = vector.broadcast %cst_112 : f32 to vector<8x32xf32>
    %476 = arith.addf %475, %474 : vector<8x32xf32>
    %477 = arith.divf %475, %476 : vector<8x32xf32>
    %478 = vector.extract_strided_slice %461 {offsets = [0, 64], sizes = [8, 32], strides = [1, 1]} : vector<8x96xf32> to vector<8x32xf32>
    %479 = vector.extract_strided_slice %464 {offsets = [0, 64], sizes = [8, 32], strides = [1, 1]} : vector<8x96xf32> to vector<8x32xf32>
    %480 = arith.mulf %471, %479 : vector<8x32xf32>
    %481 = arith.addf %478, %480 : vector<8x32xf32>
    %482 = math.tanh %481 : vector<8x32xf32>
    %cst_113 = arith.constant 1.000000e+00 : f32
    %483 = vector.broadcast %cst_113 : f32 to vector<8x32xf32>
    %484 = arith.subf %483, %477 : vector<8x32xf32>
    %485 = arith.mulf %484, %482 : vector<8x32xf32>
    %486 = arith.mulf %477, %425 : vector<8x32xf32>
    %487 = arith.addf %485, %486 : vector<8x32xf32>
    %488 = tpu.concatenate %487, %454 in 1 : vector<8x32xf32>, vector<8x32xf32> -> vector<8x64xf32>
    %cst_114 = arith.constant dense<0.000000e+00> : vector<8x128xf32>
    %489 = tpu.matmul %488, %2, %cst_114 {dimension_numbers = #tpu.dot_dimension_numbers<[1], [0], [0], [1], [0, 0, 1, 1], [], []>} : vector<8x64xf32>, vector<64x128xf32>, vector<8x128xf32> -> vector<8x128xf32>
    %490 = vector.broadcast %3 : vector<1x128xf32> to vector<8x128xf32>
    %491 = arith.addf %489, %490 : vector<8x128xf32>
    %492 = vector.extract_strided_slice %491 {offsets = [0, 0], sizes = [8, 32], strides = [1, 1]} : vector<8x128xf32> to vector<8x32xf32>
    %493 = arith.negf %492 : vector<8x32xf32>
    %494 = math.exp %493 : vector<8x32xf32>
    %cst_115 = arith.constant 1.000000e+00 : f32
    %495 = vector.broadcast %cst_115 : f32 to vector<8x32xf32>
    %496 = arith.addf %495, %494 : vector<8x32xf32>
    %497 = arith.divf %495, %496 : vector<8x32xf32>
    %498 = vector.extract_strided_slice %491 {offsets = [0, 32], sizes = [8, 32], strides = [1, 1]} : vector<8x128xf32> to vector<8x32xf32>
    %499 = arith.negf %498 : vector<8x32xf32>
    %500 = math.exp %499 : vector<8x32xf32>
    %cst_116 = arith.constant 1.000000e+00 : f32
    %501 = vector.broadcast %cst_116 : f32 to vector<8x32xf32>
    %502 = arith.addf %501, %500 : vector<8x32xf32>
    %503 = arith.divf %501, %502 : vector<8x32xf32>
    %504 = vector.extract_strided_slice %491 {offsets = [0, 64], sizes = [8, 32], strides = [1, 1]} : vector<8x128xf32> to vector<8x32xf32>
    %505 = math.tanh %504 : vector<8x32xf32>
    %506 = vector.extract_strided_slice %491 {offsets = [0, 96], sizes = [8, 32], strides = [1, 1]} : vector<8x128xf32> to vector<8x32xf32>
    %507 = arith.negf %506 : vector<8x32xf32>
    %508 = math.exp %507 : vector<8x32xf32>
    %cst_117 = arith.constant 1.000000e+00 : f32
    %509 = vector.broadcast %cst_117 : f32 to vector<8x32xf32>
    %510 = arith.addf %509, %508 : vector<8x32xf32>
    %511 = arith.divf %509, %510 : vector<8x32xf32>
    %512 = arith.mulf %503, %452 : vector<8x32xf32>
    %513 = arith.mulf %497, %505 : vector<8x32xf32>
    %514 = arith.addf %512, %513 : vector<8x32xf32>
    %515 = math.tanh %514 : vector<8x32xf32>
    %516 = arith.mulf %511, %515 : vector<8x32xf32>
    %517 = arith.index_cast %c7_i32 : i32 to index
    %c0_118 = arith.constant 0 : index
    %c0_119 = arith.constant 0 : index
    %518 = vector.load %arg23[%517, %c0_118, %c0_119] : memref<8x8x32xf32, #tpu.memory_space<vmem>>, vector<1x8x32xf32>
    %519 = vector.shape_cast %518 : vector<1x8x32xf32> to vector<8x32xf32>
    %520 = vector.shape_cast %516 : vector<8x32xf32> to vector<1x8x32xf32>
    tpu.vector_store %arg23[%517, %c0_118, %c0_119], %520 {strides = array<i32>} : memref<8x8x32xf32, #tpu.memory_space<vmem>>, vector<1x8x32xf32>,
    %c8_i32 = arith.constant 8 : i32
    %c0_120 = arith.constant 0 : index
    %c0_121 = arith.constant 0 : index
    %c0_122 = arith.constant 0 : index
    %521 = vector.load %arg23[%c0_120, %c0_121, %c0_122] : memref<8x8x32xf32, #tpu.memory_space<vmem>>, vector<8x8x32xf32>
    %522 = vector.shape_cast %521 : vector<8x8x32xf32> to vector<64x32xf32>
    %c0_123 = arith.constant 0 : index
    %c0_124 = arith.constant 0 : index
    %523 = vector.load %arg9[%c0_123, %c0_124] : memref<32x16xf32, #tpu.memory_space<vmem>>, vector<32x16xf32>
    %cst_125 = arith.constant dense<0.000000e+00> : vector<64x16xf32>
    %524 = tpu.matmul %522, %523, %cst_125 {dimension_numbers = #tpu.dot_dimension_numbers<[1], [0], [0], [1], [0, 0, 1, 1], [], []>} : vector<64x32xf32>, vector<32x16xf32>, vector<64x16xf32> -> vector<64x16xf32>
    %525 = vector.shape_cast %524 : vector<64x16xf32> to vector<8x8x16xf32>
    %c0_126 = arith.constant 0 : index
    %c0_127 = arith.constant 0 : index
    %526 = vector.load %arg10[%c0_126, %c0_127] : memref<1x16xf32, #tpu.memory_space<vmem>>, vector<1x16xf32>
    %527 = vector.shape_cast %526 : vector<1x16xf32> to vector<1x1x16xf32>
    %528 = vector.broadcast %527 : vector<1x1x16xf32> to vector<8x8x16xf32>
    %529 = arith.addf %525, %528 : vector<8x8x16xf32>
    %530 = math.tanh %529 : vector<8x8x16xf32>
    %c0_128 = arith.constant 0 : index
    %c0_129 = arith.constant 0 : index
    %531 = vector.load %arg11[%c0_128, %c0_129] : memref<1x16xf32, #tpu.memory_space<vmem>>, vector<1x16xf32>
    %532 = vector.shape_cast %531 : vector<1x16xf32> to vector<1x1x16xf32>
    %533 = vector.broadcast %532 : vector<1x1x16xf32> to vector<8x8x16xf32>
    %534 = arith.mulf %530, %533 : vector<8x8x16xf32>
    %cst_130 = arith.constant dense<0.000000e+00> : vector<8x8xf32>
    %535 = vector.multi_reduction <add>, %534, %cst_130 [2] : vector<8x8x16xf32> to vector<8x8xf32>
    %536 = vector.shape_cast %535 : vector<8x8xf32> to vector<8x8x1xf32>
    %c0_131 = arith.constant 0 : index
    %c0_132 = arith.constant 0 : index
    %537 = vector.load %arg12[%c0_131, %c0_132] : memref<1x1xf32, #tpu.memory_space<vmem>>, vector<1x1xf32>
    %538 = vector.shape_cast %537 : vector<1x1xf32> to vector<1x1x1xf32>
    %539 = vector.broadcast %538 : vector<1x1x1xf32> to vector<8x8x1xf32>
    %540 = arith.addf %536, %539 : vector<8x8x1xf32>
    %cst_133 = arith.constant dense<0xFF800000> : vector<8x1xf32>
    %541 = vector.multi_reduction <maximumf>, %540, %cst_133 [0] : vector<8x8x1xf32> to vector<8x1xf32>
    %542 = vector.shape_cast %541 : vector<8x1xf32> to vector<1x8x1xf32>
    %543 = vector.broadcast %542 : vector<1x8x1xf32> to vector<8x8x1xf32>
    %544 = arith.subf %540, %543 : vector<8x8x1xf32>
    %545 = math.exp %544 : vector<8x8x1xf32>
    %cst_134 = arith.constant dense<0.000000e+00> : vector<8x1xf32>
    %546 = vector.multi_reduction <add>, %545, %cst_134 [0] : vector<8x8x1xf32> to vector<8x1xf32>
    %547 = vector.shape_cast %546 : vector<8x1xf32> to vector<1x8x1xf32>
    %548 = vector.broadcast %547 : vector<1x8x1xf32> to vector<8x8x1xf32>
    %549 = arith.divf %545, %548 : vector<8x8x1xf32>
    %550 = vector.broadcast %549 : vector<8x8x1xf32> to vector<8x8x32xf32>
    %551 = arith.mulf %550, %521 : vector<8x8x32xf32>
    %cst_135 = arith.constant dense<0.000000e+00> : vector<8x32xf32>
    %552 = vector.multi_reduction <add>, %551, %cst_135 [0] : vector<8x8x32xf32> to vector<8x32xf32>
    %c0_136 = arith.constant 0 : index
    %c0_137 = arith.constant 0 : index
    %553 = vector.load %arg13[%c0_136, %c0_137] : memref<1x32xf32, #tpu.memory_space<vmem>>, vector<1x32xf32>
    %554 = vector.broadcast %553 : vector<1x32xf32> to vector<8x32xf32>
    %555 = arith.mulf %552, %554 : vector<8x32xf32>
    %c0_138 = arith.constant 0 : index
    %c0_139 = arith.constant 0 : index
    %556 = vector.load %arg14[%c0_138, %c0_139] : memref<1x32xf32, #tpu.memory_space<vmem>>, vector<1x32xf32>
    %557 = vector.broadcast %556 : vector<1x32xf32> to vector<8x32xf32>
    %558 = arith.addf %555, %557 : vector<8x32xf32>
    %c0_140 = arith.constant 0 : index
    %c0_141 = arith.constant 0 : index
    %559 = vector.load %arg15[%c0_140, %c0_141] : memref<32x16xf32, #tpu.memory_space<vmem>>, vector<32x16xf32>
    %cst_142 = arith.constant dense<0.000000e+00> : vector<8x16xf32>
    %560 = tpu.matmul %558, %559, %cst_142 {dimension_numbers = #tpu.dot_dimension_numbers<[1], [0], [0], [1], [0, 0, 1, 1], [], []>} : vector<8x32xf32>, vector<32x16xf32>, vector<8x16xf32> -> vector<8x16xf32>
    %c0_143 = arith.constant 0 : index
    %c0_144 = arith.constant 0 : index
    %561 = vector.load %arg16[%c0_143, %c0_144] : memref<1x16xf32, #tpu.memory_space<vmem>>, vector<1x16xf32>
    %562 = vector.broadcast %561 : vector<1x16xf32> to vector<8x16xf32>
    %563 = arith.addf %560, %562 : vector<8x16xf32>
    %cst_145 = arith.constant 0.000000e+00 : f32
    %564 = vector.broadcast %cst_145 : f32 to vector<8x16xf32>
    %565 = arith.maximumf %563, %564 : vector<8x16xf32>
    %c0_146 = arith.constant 0 : index
    %c0_147 = arith.constant 0 : index
    %566 = vector.load %arg17[%c0_146, %c0_147] : memref<1x16xf32, #tpu.memory_space<vmem>>, vector<1x16xf32>
    %567 = vector.broadcast %566 : vector<1x16xf32> to vector<8x16xf32>
    %568 = arith.mulf %565, %567 : vector<8x16xf32>
    %c0_148 = arith.constant 0 : index
    %c0_149 = arith.constant 0 : index
    %569 = vector.load %arg18[%c0_148, %c0_149] : memref<1x16xf32, #tpu.memory_space<vmem>>, vector<1x16xf32>
    %570 = vector.broadcast %569 : vector<1x16xf32> to vector<8x16xf32>
    %571 = arith.addf %568, %570 : vector<8x16xf32>
    %c0_150 = arith.constant 0 : index
    %c0_151 = arith.constant 0 : index
    %572 = vector.load %arg19[%c0_150, %c0_151] : memref<1x16xf32, #tpu.memory_space<vmem>>, vector<1x16xf32>
    %573 = vector.broadcast %572 : vector<1x16xf32> to vector<8x16xf32>
    %574 = arith.mulf %571, %573 : vector<8x16xf32>
    %cst_152 = arith.constant dense<0.000000e+00> : vector<8xf32>
    %575 = vector.multi_reduction <add>, %574, %cst_152 [1] : vector<8x16xf32> to vector<8xf32>
    %576 = vector.shape_cast %575 : vector<8xf32> to vector<8x1xf32>
    %c0_153 = arith.constant 0 : index
    %c0_154 = arith.constant 0 : index
    %577 = vector.load %arg20[%c0_153, %c0_154] : memref<1x1xf32, #tpu.memory_space<vmem>>, vector<1x1xf32>
    %578 = vector.broadcast %577 : vector<1x1xf32> to vector<8x1xf32>
    %579 = arith.addf %576, %578 : vector<8x1xf32>
    %c0_155 = arith.constant 0 : index
    %c0_156 = arith.constant 0 : index
    %580 = vector.load %arg21[%c0_155, %c0_156] : memref<8x1xf32, #tpu.memory_space<vmem>>, vector<8x1xf32>
    tpu.vector_store %arg21[%c0_155, %c0_156], %579 {strides = array<i32>} : memref<8x1xf32, #tpu.memory_space<vmem>>, vector<8x1xf32>,
    return
  }
}

</mosaic_0001>

<bundles_post_ra>
// kernel: gru_lstm_attention_forward.1
= control target key start
LH: loop header
LB: loop body
LE: loop exit
PB: predicated region body
PF: predicated region fallthrough
CT: control target
= control target key end

     0   :  { %v3271_v0 = vmov 0.0|0.0   ;;  %vm3272_vm0 = vmmov 0   ;;  %v3273_v4 = vmov 0.0   ;;  %vm126_vm1 = vcmask 130048   ;;  %s3274_s25 = smov 64   ;;  %s3992_s3 = inlined_call_operand.vmem [shape: f32[16,96], index: 3, kind: input, shape index: {}]   ;;  %s3993_s4 = inlined_call_operand.vmem [shape: f32[32,96], index: 4, kind: input, shape index: {}]   ;;  %s3994_s0 = inlined_call_operand.vmem [shape: f32[8,8,16], index: 0, kind: input, shape index: {}]   ;;  %s3995_s1 = inlined_call_operand.vmem [shape: f32[1,16], index: 1, kind: input, shape index: {}]   ;;  %s3996_s2 = inlined_call_operand.vmem [shape: f32[1,16], index: 2, kind: input, shape index: {}]   ;;  %s3997_s5 = inlined_call_operand.vmem [shape: f32[1,96], index: 5, kind: input, shape index: {}]   ;;  %s3998_s6 = inlined_call_operand.vmem [shape: f32[1,96], index: 6, kind: input, shape index: {}]   ;;  %s3999_s7 = inlined_call_operand.vmem [shape: f32[64,128], index: 7, kind: input, shape index: {}]   ;;  %s4000_s8 = inlined_call_operand.vmem [shape: f32[1,128], index: 8, kind: input, shape index: {}]   ;;  %s4001_s9 = inlined_call_operand.vmem [shape: f32[32,16], index: 9, kind: input, shape index: {}]   ;;  %s4002_s10 = inlined_call_operand.vmem [shape: f32[1,16], index: 10, kind: input, shape index: {}]   ;;  %s4003_s12 = inlined_call_operand.<no memory space> [shape: f32[1,1], index: 12, kind: input, shape index: {}]   ;;  %s4004_s11 = inlined_call_operand.vmem [shape: f32[1,16], index: 11, kind: input, shape index: {}]   ;;  %s4005_s15 = inlined_call_operand.vmem [shape: f32[32,16], index: 15, kind: input, shape index: {}]   ;;  %s4006_s13 = inlined_call_operand.vmem [shape: f32[1,32], index: 13, kind: input, shape index: {}]   ;;  %s4007_s14 = inlined_call_operand.vmem [shape: f32[1,32], index: 14, kind: input, shape index: {}]   ;;  %s4008_s20 = inlined_call_operand.<no memory space> [shape: f32[1,1], index: 20, kind: input, shape index: {}]   ;;  %s4009_s16 = inlined_call_operand.vmem [shape: f32[1,16], index: 16, kind: input, shape index: {}]   ;;  %s4010_s17 = inlined_call_operand.vmem [shape: f32[1,16], index: 17, kind: input, shape index: {}]   ;;  %s4011_s18 = inlined_call_operand.vmem [shape: f32[1,16], index: 18, kind: input, shape index: {}]   ;;  %s4012_s19 = inlined_call_operand.vmem [shape: f32[1,16], index: 19, kind: input, shape index: {}]   ;;  %s4013_s21 = inlined_call_operand.vmem [shape: f32[8,1], index: 21, kind: output, shape index: {}]  }
   0x1   :  { %4017 = sst [smem:[#allocation6_spill]] %s3992_s3  ;;  %2957 = vmatprep.subr.bf16.mxu1 %v3271_v0  ;;  %2690 = vmatprep.mubr.msk.f32.mxu1 %vm3272_vm0, %v3273_v4  ;;  %vm271_vm2 = vcmask 785408   ;;  %v3457_v24 = vld [vmem:[%s3998_s6] ss:$0 sm:$0xff]  ;;  %v78_v42 = vld [vmem:[%s3999_s7 + $0x8] sm:$0xff]  ;;  %v79_v45 = vld [vmem:[%s3999_s7 + $0x10] sm:$0xff] }
   0x2   :  { %4018 = sst [smem:[#allocation7_spill]] %s3993_s4  ;;  %s4023_s26 = sld [smem:[#allocation6_spill]]  ;;  %v77_v41 = vld [vmem:[%s3999_s7] sm:$0xff]  ;;  %v80_v48 = vld [vmem:[%s3999_s7 + $0x18] sm:$0xff]  ;;  %v82_v59 = vld [vmem:[%s3999_s7 + $0x28] sm:$0xff]  ;;  %vm287_vm3 = vcmask 261120  }
   0x3   :  { %4019 = sst [smem:[#allocation8_spill]] %s3994_s0  ;;  %s4024_s29 = sld [smem:[#allocation7_spill]]  ;;  %v3485_v47 = vpack.c.bf16 %v78_v42, %v77_v41  ;;  %v3503_v55 = vpack.c.bf16 %v80_v48, %v79_v45  ;;  %v81_v58 = vld [vmem:[%s3999_s7 + $0x20] sm:$0xff]  ;;  %vm398_vm4 = vcmask 523264   ;;  %vm2196_vm5 = vcmask 7168  }
   0x4   :  { %4020 = sst [smem:[#allocation9_spill]] %s3995_s1  ;;  %s4025_s23 = sld [smem:[#allocation8_spill]] }
   0x5   :  { %4021 = sst [smem:[#allocation10_spill]] %s3996_s2  ;;  %s4026_s0 = sld [smem:[#allocation9_spill]] }
   0x6   :  { %4022 = sst [smem:[#allocation11_spill]] %s3997_s5  ;;  %s4027_s27 = sld [smem:[#allocation10_spill]] }
   0x7   :  { %s4028_s4 = sld [smem:[#allocation11_spill]] }
   0x8   :  { %v124_v1 = vld [vmem:[%s4023_s26] sm:$0xff]  ;;  %v125_v2 = vld [vmem:[%s4023_s26 + $0x8] sm:$0xff] }
   0x9   :  { %v72_v3 = vld [vmem:[%s4024_s29] sm:$0xff]  ;;  %v2953_v5 = vpack.c.bf16 %v125_v2, %v124_v1  ;;  %v73_v6 = vld [vmem:[%s4024_s29 + $0x8] sm:$0xff]  ;;  %v74_v13 = vld [vmem:[%s4024_s29 + $0x10] sm:$0xff]  ;;  %v3521_v1 = vpack.c.bf16 %v82_v59, %v81_v58 }
   0xa   :  { %v86_v7 = vld [vmem:[%s4025_s23] sm:$0xff]  ;;  %v3411_v9 = vpack.c.bf16 %v73_v6, %v72_v3  ;;  %v87_v12 = vld [vmem:[%s4025_s23 + $0x8] sm:$0xff]  ;;  %v75_v15 = vld [vmem:[%s4024_s29 + $0x18] sm:$0xff] }
   0xb   :  { %v3409_v8 = vld [vmem:[%s4026_s0] ss:$0 sm:$0xff]  ;;  %2954 = vmatprep.subr.bf16.mxu0 %v2953_v5  ;;  %v3431_v17 = vpack.c.bf16 %v75_v15, %v74_v13  ;;  %v88_v38 = vld [vmem:[%s4025_s23 + $0x10] sm:$0xff]  ;;  %v89_v39 = vld [vmem:[%s4025_s23 + $0x18] sm:$0xff] }
   0xc   :  { %v101_v10 = vmul.f32 %v3409_v8, %v86_v7  ;;  %v3417_v11 = vld [vmem:[%s4027_s27] ss:$0 sm:$0xff]  ;;  %v102_v14 = vmul.f32 %v3409_v8, %v87_v12  ;;  %2959 = vmatpush3.bf16.msra.mxu1 %v3411_v9  ;;  %2956 = vmatpush3.bf16.msra.mxu0 %v2953_v5  ;;  %v103_v43 = vmul.f32 %v3409_v8, %v88_v38  ;;  %v91_v49 = vld [vmem:[%s4025_s23 + $0x28] sm:$0xff]  ;;  %v92_v53 = vld [vmem:[%s4025_s23 + $0x30] sm:$0xff] }
   0xd   :  { %2960 = vmatprep.subr.bf16.mxu1 %v3271_v0  ;;  %2963 = vmatprep.subr.bf16.mxu0 %v3271_v0  ;;  %v3450_v19 = vld [vmem:[%s4028_s4] ss:$0 sm:$0xff]  ;;  %v104_v44 = vmul.f32 %v3409_v8, %v89_v39  ;;  %v93_v54 = vld [vmem:[%s4025_s23 + $0x38] sm:$0xff]  ;;  %v106_v56 = vmul.f32 %v3409_v8, %v91_v49  ;;  %v107_v57 = vmul.f32 %v3409_v8, %v92_v53  ;;  %v83_v2 = vld [vmem:[%s3999_s7 + $0x30] sm:$0xff] }
   0xe   :  { %v116_v16 = vadd.f32 %v3417_v11, %v101_v10  ;;  %v117_v18 = vadd.f32 %v3417_v11, %v102_v14  ;;  %v90_v40 = vld [vmem:[%s4025_s23 + $0x20] sm:$0xff]  ;;  %v118_v50 = vadd.f32 %v3417_v11, %v103_v43  ;;  %v108_v61 = vmul.f32 %v3409_v8, %v93_v54  ;;  %s3275_s23 = smov 96   ;;  %v84_v3 = vld [vmem:[%s3999_s7 + $0x38] sm:$0xff] }
   0xf   :  { %v105_v46 = vmul.f32 %v3409_v8, %v90_v40  ;;  %v119_v51 = vadd.f32 %v3417_v11, %v104_v44  ;;  %v121_v60 = vadd.f32 %v3417_v11, %v106_v56  ;;  %v122_v62 = vadd.f32 %v3417_v11, %v107_v57 }
  0x10   :  { %2670 = vmatprep.mubr.msk.f32.mxu0 %vm126_vm1, %v116_v16  ;;  %2962 = vmatpush3.bf16.msra.mxu1 %v3431_v17  ;;  %v123_v5 = vadd.f32 %v3417_v11, %v108_v61  ;;  %v3535_v6 = vpack.c.bf16 %v84_v3, %v83_v2 }
  0x11   :  { %2671 = vmatmul.mubr.msk.f32.vlgmr.msra.gmra.mrb[0].mxu0 %vm126_vm1, %v117_v18  ;;  %2975 = vmatprep.subr.bf16.mxu1 %v3271_v0  ;;  %v120_v52 = vadd.f32 %v3417_v11, %v105_v46 }
  0x12   :  { %2965 = vmatpush3.bf16.msra.mxu0 %v3485_v47  ;;  %2673 = vmatprep.mubr.msk.f32.mxu0 %vm126_vm1, %v118_v50 }
  0x13   :  { %2691 = vmatmul.mubr.f32.vlgmr.msra.gmra.mrb[0].mxu1 %v3273_v4  ;;  %2966 = vmatprep.subr.bf16.mxu0 %v3271_v0 }
  0x14   :  { %2977 = vmatpush3.bf16.msra.mxu1 %v3411_v9  ;;  %2720 = vmatprep.mubr.msk.f32.mxu1 %vm3272_vm0, %v3273_v4 }
  0x15   :  { %2978 = vmatprep.subr.bf16.mxu1 %v3271_v0  ;;  %2674 = vmatmul.mubr.msk.f32.gmra.mrb[2].mxu0 %vm126_vm1, %v119_v51 }
  0x16   :  { %2676 = vmatprep.mubr.msk.f32.mxu0 %vm126_vm1, %v120_v52  ;;  %2968 = vmatpush3.bf16.msra.mxu0 %v3503_v55 }
  0x17   :  { %2969 = vmatprep.subr.bf16.mxu0 %v3271_v0 }
  0x18   :  { %2980 = vmatpush3.bf16.msra.mxu1 %v3431_v17 }
  0x19   :  { %2981 = vmatprep.subr.bf16.mxu1 %v3271_v0  ;;  %2677 = vmatmul.mubr.msk.f32.gmra.mrb[4].mxu0 %vm126_vm1, %v121_v60 }
  0x1a   :  { %2679 = vmatprep.mubr.msk.f32.mxu0 %vm126_vm1, %v122_v62  ;;  %2971 = vmatpush3.bf16.msra.mxu0 %v3521_v1 }
  0x1b   :  { %2972 = vmatprep.subr.bf16.mxu0 %v3271_v0 }
  0x1d   :  { %2680 = vmatmul.mubr.msk.f32.gmra.mrb[6].mxu0 %vm126_vm1, %v123_v5 }
  0x1e   :  { %2709 = vmatprep.mubr.msk.f32.mxu0 %vm3272_vm0, %v3273_v4  ;;  %2974 = vmatpush3.bf16.msra.mxu0 %v3535_v6 }
  0x1f   :  { %2993 = vmatprep.subr.bf16.mxu0 %v3271_v0 }
  0xe4   :  { %v2672_v20 = vpop.f32.mrb[0].mxu0 }
  0xe5   :  { %v264_v21 = vadd.f32 %v2672_v20, %v3450_v19  ;;  %v217_v22 = vpop.f32.mrb[1].mxu0 }
  0xe6   :  { %v263_v23 = vadd.f32 %v3450_v19, %v217_v22  ;;  %v357_v25 = vpop.f32.mrb[0].mxu1 }
  0xe7   :  { %273 = vst.msk [vmem:[#allocation2 + $0x8] sm:$0xff] %vm271_vm2, %v264_v21  ;;  %v358_v26 = vadd.f32 %v3457_v24, %v357_v25  ;;  %v2692_v27 = vpop.f32.mrb[1].mxu1 }
  0xe8   :  { %272 = vst.msk [vmem:[#allocation2] sm:$0xff] %vm271_vm2, %v263_v23  ;;  %v2675_v13 = vpop.f32.mrb[2].mxu0 }
  0xe9   :  { %369 = vrot.lane.b32.xlu0 %v358_v26, %s3274_s25  ;;  %v266_v14 = vadd.f32 %v2675_v13, %v3450_v19  ;;  %v227_v15 = vpop.f32.mrb[3].mxu0 }
  0xea   :  { %v265_v16 = vadd.f32 %v3450_v19, %v227_v15 }
  0xeb   :  { %275 = vst.msk [vmem:[#allocation2 + $0x18] sm:$0xff] %vm271_vm2, %v266_v14 }
  0xec   :  { %274 = vst.msk [vmem:[#allocation2 + $0x10] sm:$0xff] %vm271_vm2, %v265_v16  ;;  %v2678_v18 = vpop.f32.mrb[4].mxu0 }
  0xed   :  { %v268_v20 = vadd.f32 %v2678_v18, %v3450_v19  ;;  %v237_v21 = vpop.f32.mrb[5].mxu0 }
  0xee   :  { %v267_v22 = vadd.f32 %v3450_v19, %v237_v21 }
  0xef   :  { %v280_v28 = vld [vmem:[#allocation2] sm:$0xff]  ;;  %277 = vst.msk [vmem:[#allocation2 + $0x28] sm:$0xff] %vm271_vm2, %v268_v20 }
  0xf0   :  { %v361_v29 = vadd.f32 %v358_v26, %v280_v28  ;;  %276 = vst.msk [vmem:[#allocation2 + $0x20] sm:$0xff] %vm271_vm2, %v267_v22  ;;  %v2681_v23 = vpop.f32.mrb[6].mxu0 }
  0xf1   :  { %v270_v25 = vadd.f32 %v2681_v23, %v3450_v19  ;;  %v247_v26 = vpop.f32.mrb[7].mxu0 }
  0xf2   :  { %v2476_v30 = vmul.f32 -1.442695, %v361_v29  ;;  %v269_v27 = vadd.f32 %v3450_v19, %v247_v26  ;;  %v3581_v19 = vld [vmem:[%s4000_s8] ss:$0 sm:$0xff]  ;;  %s3276_s8 = smov 32  }
  0xf3   :  { %279 = vst.msk [vmem:[#allocation2 + $0x38] sm:$0xff] %vm271_vm2, %v270_v25  ;;  %v713_v20 = vld [vmem:[#allocation2 + $0x10] sm:$0xff] }
  0xf4   :  { %3124 = vpow2.f32 %v2476_v30  ;;  %278 = vst.msk [vmem:[#allocation2 + $0x30] sm:$0xff] %vm271_vm2, %v269_v27 }
  0xfe   :  { %v3125_v31 = vpop.eup %3124 }
  0xff   :  { %v365_v32 = vadd.f32 1.0, %v3125_v31 }
 0x101   :  { %3126 = vrcp.f32 %v365_v32 }
 0x10b   :  { %v3127_v33 = vpop.eup %3126 }
 0x10c   :  { %v379_v7 = vsub.f32 1.0, %v3127_v33  ;;  %v385_v10 = vmul.f32 0.0, %v3127_v33 }
 0x15b   :  { %v370_v34 = vpop.permute.xlu0 %369 }
 0x15c   :  { %v372_v35 = vmul.f32 %v3127_v33, %v370_v34 }
 0x15e   :  { %374 = vrot.lane.b32.xlu0 %v372_v35, %s3274_s25 }
 0x1d0   :  { %v375_v36 = vpop.permute.xlu0 %374 }
 0x1d1   :  { %v377_v37 = vadd.f32 %v375_v36, %v280_v28 }
 0x1d3   :  { %3128 = vtanh.f32 %v377_v37  ;;  %v502_v37 = vld [vmem:[#allocation2 + $0x8] sm:$0xff] }
 0x1dd   :  { %v3129_v63 = vpop.eup %3128 }
 0x1de   :  { %381 = vrot.lane.b32.xlu1 %v3129_v63, %s3275_s23 }
 0x250   :  { %v382_v8 = vpop.permute.xlu1 %381 }
 0x251   :  { %v384_v11 = vmul.f32 %v382_v8, %v379_v7 }
 0x253   :  { %v3543_v12 = vadd.f32 %v385_v10, %v384_v11 }
 0x255   :  { %388 = vrot.lane.b32.xlu1 %v3543_v12, %s3275_s23 }
 0x2c7   :  { %v389_v28 = vpop.permute.xlu1 %388 }
 0x2c8   :  { %v391_v29 = vsel %vm287_vm3, %v389_v28, 0.0  ;;  %2721 = vmatmul.mubr.msk.f32.vlgmr.msra.gmra.mrb[2].mxu1 %vm287_vm3, %v389_v28 }
 0x2c9   :  { %2710 = vmatmul.mubr.msk.f32.vlgmr.msra.gmra.mrb[8].mxu0 %vm398_vm4, %v391_v29  ;;  %2983 = vmatpush3.bf16.msra.mxu1 %v3485_v47 }
 0x2ca   :  { %2995 = vmatpush3.bf16.msra.mxu0 %v3411_v9  ;;  %2984 = vmatprep.subr.bf16.mxu1 %v3271_v0 }
 0x2cb   :  { %2996 = vmatprep.subr.bf16.mxu0 %v3271_v0  ;;  %2750 = vmatprep.mubr.msk.f32.mxu0 %vm3272_vm0, %v3273_v4 }
 0x2cc   :  { %2739 = vmatprep.mubr.msk.f32.mxu1 %vm3272_vm0, %v3273_v4 }
 0x2cd   :  { %2986 = vmatpush3.bf16.msra.mxu1 %v3503_v55 }
 0x2ce   :  { %2998 = vmatpush3.bf16.msra.mxu0 %v3431_v17  ;;  %2987 = vmatprep.subr.bf16.mxu1 %v3271_v0 }
 0x2cf   :  { %2999 = vmatprep.subr.bf16.mxu0 %v3271_v0 }
 0x2d1   :  { %2989 = vmatpush3.bf16.msra.mxu1 %v3521_v1 }
 0x2d2   :  { %2990 = vmatprep.subr.bf16.mxu1 %v3271_v0 }
 0x2d5   :  { %2992 = vmatpush3.bf16.msra.mxu1 %v3535_v6 }
 0x2d6   :  { %3011 = vmatprep.subr.bf16.mxu1 %v3271_v0 }
 0x39b   :  { %v571_v30 = vpop.f32.mrb[2].mxu1 }
 0x39c   :  { %v572_v31 = vadd.f32 %v3457_v24, %v571_v30  ;;  %v468_v32 = vpop.f32.mrb[8].mxu0  ;;  %v2722_v33 = vpop.f32.mrb[3].mxu1 }
 0x39d   :  { %v469_v34 = vadd.f32 %v3581_v19, %v468_v32  ;;  %v2711_v35 = vpop.f32.mrb[9].mxu0 }
 0x39e   :  { %583 = vrot.lane.b32.xlu0 %v572_v31, %s3274_s25  ;;  %v575_v38 = vadd.f32 %v572_v31, %v502_v37 }
 0x39f   :  { %3130 = vtanh.f32 %v469_v34  ;;  %v2479_v40 = vmul.f32 -1.442695, %v469_v34 }
 0x3a0   :  { %v2481_v39 = vmul.f32 -1.442695, %v575_v38 }
 0x3a2   :  { %3132 = vpow2.f32 %v2481_v39 }
 0x3a3   :  { %3134 = vpow2.f32 %v2479_v40 }
 0x3a9   :  { %v3131_v36 = vpop.eup %3130 }
 0x3aa   :  { %481 = vrot.lane.b32.xlu1 %v3131_v36, %s3274_s25 }
 0x3ac   :  { %v3133_v41 = vpop.eup %3132 }
 0x3ad   :  { %v579_v42 = vadd.f32 1.0, %v3133_v41  ;;  %v3135_v43 = vpop.eup %3134 }
 0x3ae   :  { %v475_v44 = vadd.f32 1.0, %v3135_v43 }
 0x3af   :  { %3136 = vrcp.f32 %v579_v42 }
 0x3b0   :  { %3138 = vrcp.f32 %v475_v44 }
 0x3b9   :  { %v3137_v45 = vpop.eup %3136 }
 0x3ba   :  { %v3139_v49 = vpop.eup %3138  ;;  %v593_v60 = vsub.f32 1.0, %v3137_v45  ;;  %v599_v62 = vmul.f32 %v3137_v45, %v3543_v12 }
 0x3bb   :  { %v479_v54 = vmul.f32 0.0, %v3139_v49 }
 0x410   :  { %v584_v46 = vpop.permute.xlu0 %583 }
 0x411   :  { %v586_v48 = vmul.f32 %v3137_v45, %v584_v46 }
 0x413   :  { %588 = vrot.lane.b32.xlu0 %v586_v48, %s3274_s25 }
 0x41c   :  { %v482_v50 = vpop.permute.xlu1 %481 }
 0x41d   :  { %v484_v51 = vmul.f32 %v3139_v49, %v482_v50 }
 0x41f   :  { %486 = vrot.lane.b32.xlu1 %v484_v51, %s3276_s8 }
 0x485   :  { %v589_v52 = vpop.permute.xlu0 %588 }
 0x486   :  { %v591_v53 = vadd.f32 %v589_v52, %v502_v37 }
 0x488   :  { %3140 = vtanh.f32 %v591_v53 }
 0x491   :  { %v487_v56 = vpop.permute.xlu1 %486 }
 0x492   :  { %v3141_v57 = vpop.eup %3140  ;;  %v3589_v58 = vadd.f32 %v487_v56, %v479_v54 }
 0x493   :  { %595 = vrot.lane.b32.xlu0 %v3141_v57, %s3275_s23 }
 0x494   :  { %3142 = vtanh.f32 %v3589_v58 }
 0x49e   :  { %v3143_v59 = vpop.eup %3142 }
 0x49f   :  { %492 = vrot.lane.b32.xlu1 %v3143_v59, %s3274_s25 }
 0x505   :  { %v596_v61 = vpop.permute.xlu0 %595 }
 0x506   :  { %v598_v63 = vmul.f32 %v596_v61, %v593_v60  ;;  %v924_v61 = vld [vmem:[#allocation2 + $0x18] sm:$0xff] }
 0x508   :  { %v3595_v2 = vadd.f32 %v599_v62, %v598_v63 }
 0x50a   :  { %602 = vrot.lane.b32.xlu0 %v3595_v2, %s3275_s23 }
 0x511   :  { %v493_v3 = vpop.permute.xlu1 %492 }
 0x512   :  { %v3599_v5 = vmul.f32 %v3139_v49, %v493_v3 }
 0x514   :  { %605 = vrot.lane.b32.xlu1 %v3599_v5, %s3274_s25 }
 0x57c   :  { %v603_v7 = vpop.permute.xlu0 %602 }
 0x57d   :  { %2751 = vmatmul.mubr.msk.f32.vlgmr.msra.gmra.mrb[10].mxu0 %vm287_vm3, %v603_v7 }
 0x57e   :  { %3001 = vmatpush3.bf16.msra.mxu0 %v3485_v47  ;;  %2769 = vmatprep.mubr.msk.f32.mxu0 %vm3272_vm0, %v3273_v4 }
 0x57f   :  { %3002 = vmatprep.subr.bf16.mxu0 %v3271_v0 }
 0x582   :  { %3004 = vmatpush3.bf16.msra.mxu0 %v3503_v55 }
 0x583   :  { %3005 = vmatprep.subr.bf16.mxu0 %v3271_v0 }
 0x586   :  { %v606_v8 = vpop.permute.xlu1 %605  ;;  %3007 = vmatpush3.bf16.msra.mxu0 %v3521_v1 }
 0x587   :  { %v608_v10 = vsel %vm287_vm3, %v603_v7, %v606_v8  ;;  %3008 = vmatprep.subr.bf16.mxu0 %v3271_v0 }
 0x588   :  { %2740 = vmatmul.mubr.msk.f32.vlgmr.msra.gmra.mrb[4].mxu1 %vm398_vm4, %v608_v10 }
 0x589   :  { %3013 = vmatpush3.bf16.msra.mxu1 %v3411_v9  ;;  %2780 = vmatprep.mubr.msk.f32.mxu1 %vm3272_vm0, %v3273_v4 }
 0x58a   :  { %3014 = vmatprep.subr.bf16.mxu1 %v3271_v0  ;;  %3010 = vmatpush3.bf16.msra.mxu0 %v3535_v6 }
 0x58b   :  { %3029 = vmatprep.subr.bf16.mxu0 %v3271_v0 }
 0x58d   :  { %3016 = vmatpush3.bf16.msra.mxu1 %v3431_v17 }
 0x58e   :  { %3017 = vmatprep.subr.bf16.mxu1 %v3271_v0 }
 0x650   :  { %v782_v11 = vpop.f32.mrb[10].mxu0 }
 0x651   :  { %v783_v12 = vadd.f32 %v3457_v24, %v782_v11  ;;  %v2752_v13 = vpop.f32.mrb[11].mxu0 }
 0x653   :  { %794 = vrot.lane.b32.xlu0 %v783_v12, %s3274_s25  ;;  %v786_v21 = vadd.f32 %v783_v12, %v713_v20 }
 0x655   :  { %v2485_v22 = vmul.f32 -1.442695, %v786_v21 }
 0x65b   :  { %v678_v14 = vpop.f32.mrb[4].mxu1 }
 0x65c   :  { %v679_v15 = vadd.f32 %v3581_v19, %v678_v14  ;;  %v2741_v16 = vpop.f32.mrb[5].mxu1 }
 0x65e   :  { %3144 = vtanh.f32 %v679_v15  ;;  %v2483_v26 = vmul.f32 -1.442695, %v679_v15 }
 0x65f   :  { %3146 = vpow2.f32 %v2485_v22 }
 0x668   :  { %v3145_v18 = vpop.eup %3144 }
 0x669   :  { %691 = vrot.lane.b32.xlu1 %v3145_v18, %s3274_s25  ;;  %v3147_v23 = vpop.eup %3146 }
 0x66a   :  { %v790_v25 = vadd.f32 1.0, %v3147_v23 }
 0x66c   :  { %3148 = vrcp.f32 %v790_v25 }
 0x66d   :  { %3150 = vpow2.f32 %v2483_v26 }
 0x676   :  { %v3149_v27 = vpop.eup %3148 }
 0x677   :  { %v3151_v30 = vpop.eup %3150  ;;  %v804_v42 = vsub.f32 1.0, %v3149_v27  ;;  %v810_v44 = vmul.f32 %v3149_v27, %v3595_v2 }
 0x678   :  { %v685_v31 = vadd.f32 1.0, %v3151_v30 }
 0x67a   :  { %3152 = vrcp.f32 %v685_v31 }
 0x684   :  { %v3153_v32 = vpop.eup %3152 }
 0x685   :  { %v689_v38 = vmul.f32 %v3153_v32, %v3589_v58 }
 0x6c5   :  { %v795_v28 = vpop.permute.xlu0 %794 }
 0x6c6   :  { %v797_v29 = vmul.f32 %v3149_v27, %v795_v28 }
 0x6c8   :  { %799 = vrot.lane.b32.xlu0 %v797_v29, %s3274_s25 }
 0x6db   :  { %v692_v33 = vpop.permute.xlu1 %691 }
 0x6dc   :  { %v694_v34 = vmul.f32 %v3153_v32, %v692_v33 }
 0x6de   :  { %696 = vrot.lane.b32.xlu1 %v694_v34, %s3276_s8 }
 0x73a   :  { %v800_v35 = vpop.permute.xlu0 %799 }
 0x73b   :  { %v802_v36 = vadd.f32 %v800_v35, %v713_v20 }
 0x73d   :  { %3154 = vtanh.f32 %v802_v36 }
 0x747   :  { %v3155_v37 = vpop.eup %3154 }
 0x748   :  { %806 = vrot.lane.b32.xlu0 %v3155_v37, %s3275_s23 }
 0x750   :  { %v697_v39 = vpop.permute.xlu1 %696 }
 0x751   :  { %v3630_v40 = vadd.f32 %v697_v39, %v689_v38 }
 0x753   :  { %3156 = vtanh.f32 %v3630_v40 }
 0x75d   :  { %v3157_v41 = vpop.eup %3156 }
 0x75e   :  { %702 = vrot.lane.b32.xlu1 %v3157_v41, %s3274_s25 }
 0x7ba   :  { %v807_v43 = vpop.permute.xlu0 %806 }
 0x7bb   :  { %v809_v45 = vmul.f32 %v807_v43, %v804_v42 }
 0x7bd   :  { %v3635_v46 = vadd.f32 %v810_v44, %v809_v45  ;;  %v1135_v44 = vld [vmem:[#allocation2 + $0x20] sm:$0xff] }
 0x7bf   :  { %813 = vrot.lane.b32.xlu0 %v3635_v46, %s3275_s23 }
 0x7d0   :  { %v703_v48 = vpop.permute.xlu1 %702 }
 0x7d1   :  { %v3639_v49 = vmul.f32 %v3153_v32, %v703_v48 }
 0x7d3   :  { %816 = vrot.lane.b32.xlu1 %v3639_v49, %s3274_s25 }
 0x831   :  { %v814_v50 = vpop.permute.xlu0 %813 }
 0x832   :  { %2781 = vmatmul.mubr.msk.f32.vlgmr.msra.gmra.mrb[6].mxu1 %vm287_vm3, %v814_v50 }
 0x833   :  { %3019 = vmatpush3.bf16.msra.mxu1 %v3485_v47  ;;  %2799 = vmatprep.mubr.msk.f32.mxu1 %vm3272_vm0, %v3273_v4 }
 0x834   :  { %3020 = vmatprep.subr.bf16.mxu1 %v3271_v0 }
 0x837   :  { %3022 = vmatpush3.bf16.msra.mxu1 %v3503_v55 }
 0x838   :  { %3023 = vmatprep.subr.bf16.mxu1 %v3271_v0 }
 0x83b   :  { %3025 = vmatpush3.bf16.msra.mxu1 %v3521_v1 }
 0x83c   :  { %3026 = vmatprep.subr.bf16.mxu1 %v3271_v0 }
 0x83f   :  { %3028 = vmatpush3.bf16.msra.mxu1 %v3535_v6 }
 0x840   :  { %3047 = vmatprep.subr.bf16.mxu1 %v3271_v0 }
 0x845   :  { %v817_v51 = vpop.permute.xlu1 %816 }
 0x846   :  { %v819_v52 = vsel %vm287_vm3, %v814_v50, %v817_v51 }
 0x847   :  { %2770 = vmatmul.mubr.msk.f32.vlgmr.msra.gmra.mrb[12].mxu0 %vm398_vm4, %v819_v52 }
 0x848   :  { %3031 = vmatpush3.bf16.msra.mxu0 %v3411_v9  ;;  %2810 = vmatprep.mubr.msk.f32.mxu0 %vm3272_vm0, %v3273_v4 }
 0x849   :  { %3032 = vmatprep.subr.bf16.mxu0 %v3271_v0 }
 0x84c   :  { %3034 = vmatpush3.bf16.msra.mxu0 %v3431_v17 }
 0x84d   :  { %3035 = vmatprep.subr.bf16.mxu0 %v3271_v0 }
 0x905   :  { %v993_v53 = vpop.f32.mrb[6].mxu1 }
 0x906   :  { %v994_v54 = vadd.f32 %v3457_v24, %v993_v53  ;;  %v2782_v56 = vpop.f32.mrb[7].mxu1 }
 0x908   :  { %1005 = vrot.lane.b32.xlu0 %v994_v54, %s3274_s25  ;;  %v997_v62 = vadd.f32 %v994_v54, %v924_v61 }
 0x90a   :  { %v2489_v63 = vmul.f32 -1.442695, %v997_v62 }
 0x91a   :  { %v889_v57 = vpop.f32.mrb[12].mxu0 }
 0x91b   :  { %v890_v58 = vadd.f32 %v3581_v19, %v889_v57  ;;  %v2771_v59 = vpop.f32.mrb[13].mxu0 }
 0x91d   :  { %3158 = vtanh.f32 %v890_v58  ;;  %v2487_v10 = vmul.f32 -1.442695, %v890_v58 }
 0x91e   :  { %3160 = vpow2.f32 %v2489_v63 }
 0x927   :  { %v3159_v60 = vpop.eup %3158 }
 0x928   :  { %902 = vrot.lane.b32.xlu1 %v3159_v60, %s3274_s25  ;;  %v3161_v2 = vpop.eup %3160 }
 0x929   :  { %v1001_v3 = vadd.f32 1.0, %v3161_v2 }
 0x92b   :  { %3162 = vrcp.f32 %v1001_v3 }
 0x92c   :  { %3164 = vpow2.f32 %v2487_v10 }
 0x935   :  { %v3163_v7 = vpop.eup %3162 }
 0x936   :  { %v3165_v12 = vpop.eup %3164  ;;  %v1015_v27 = vsub.f32 1.0, %v3163_v7  ;;  %v1021_v29 = vmul.f32 %v3163_v7, %v3635_v46 }
 0x937   :  { %v896_v13 = vadd.f32 1.0, %v3165_v12 }
 0x939   :  { %3166 = vrcp.f32 %v896_v13 }
 0x943   :  { %v3167_v14 = vpop.eup %3166 }
 0x944   :  { %v900_v22 = vmul.f32 %v3167_v14, %v3630_v40 }
 0x97a   :  { %v1006_v8 = vpop.permute.xlu0 %1005 }
 0x97b   :  { %v1008_v11 = vmul.f32 %v3163_v7, %v1006_v8 }
 0x97d   :  { %1010 = vrot.lane.b32.xlu0 %v1008_v11, %s3274_s25 }
 0x99a   :  { %v903_v15 = vpop.permute.xlu1 %902 }
 0x99b   :  { %v905_v16 = vmul.f32 %v3167_v14, %v903_v15 }
 0x99d   :  { %907 = vrot.lane.b32.xlu1 %v905_v16, %s3276_s8 }
 0x9ef   :  { %v1011_v18 = vpop.permute.xlu0 %1010 }
 0x9f0   :  { %v1013_v20 = vadd.f32 %v1011_v18, %v924_v61 }
 0x9f2   :  { %3168 = vtanh.f32 %v1013_v20 }
 0x9fc   :  { %v3169_v21 = vpop.eup %3168 }
 0x9fd   :  { %1017 = vrot.lane.b32.xlu0 %v3169_v21, %s3275_s23 }
 0xa0f   :  { %v908_v23 = vpop.permute.xlu1 %907 }
 0xa10   :  { %v3670_v25 = vadd.f32 %v908_v23, %v900_v22 }
 0xa12   :  { %3170 = vtanh.f32 %v3670_v25 }
 0xa1c   :  { %v3171_v26 = vpop.eup %3170 }
 0xa1d   :  { %913 = vrot.lane.b32.xlu1 %v3171_v26, %s3274_s25 }
 0xa6f   :  { %v1018_v28 = vpop.permute.xlu0 %1017 }
 0xa70   :  { %v1020_v30 = vmul.f32 %v1018_v28, %v1015_v27 }
 0xa72   :  { %v3675_v31 = vadd.f32 %v1021_v29, %v1020_v30  ;;  %v1346_v30 = vld [vmem:[#allocation2 + $0x28] sm:$0xff] }
 0xa74   :  { %1024 = vrot.lane.b32.xlu0 %v3675_v31, %s3275_s23 }
 0xa8f   :  { %v914_v32 = vpop.permute.xlu1 %913 }
 0xa90   :  { %v3679_v33 = vmul.f32 %v3167_v14, %v914_v32 }
 0xa92   :  { %1027 = vrot.lane.b32.xlu1 %v3679_v33, %s3274_s25 }
 0xae6   :  { %v1025_v34 = vpop.permute.xlu0 %1024 }
 0xae7   :  { %2811 = vmatmul.mubr.msk.f32.vlgmr.msra.gmra.mrb[14].mxu0 %vm287_vm3, %v1025_v34 }
 0xae8   :  { %3037 = vmatpush3.bf16.msra.mxu0 %v3485_v47  ;;  %2829 = vmatprep.mubr.msk.f32.mxu0 %vm3272_vm0, %v3273_v4 }
 0xae9   :  { %3038 = vmatprep.subr.bf16.mxu0 %v3271_v0 }
 0xaec   :  { %3040 = vmatpush3.bf16.msra.mxu0 %v3503_v55 }
 0xaed   :  { %3041 = vmatprep.subr.bf16.mxu0 %v3271_v0 }
 0xaf0   :  { %3043 = vmatpush3.bf16.msra.mxu0 %v3521_v1 }
 0xaf1   :  { %3044 = vmatprep.subr.bf16.mxu0 %v3271_v0 }
 0xaf4   :  { %3046 = vmatpush3.bf16.msra.mxu0 %v3535_v6 }
 0xaf5   :  { %3065 = vmatprep.subr.bf16.mxu0 %v3271_v0 }
 0xb04   :  { %v1028_v35 = vpop.permute.xlu1 %1027 }
 0xb05   :  { %v1030_v36 = vsel %vm287_vm3, %v1025_v34, %v1028_v35 }
 0xb06   :  { %2800 = vmatmul.mubr.msk.f32.vlgmr.msra.gmra.mrb[8].mxu1 %vm398_vm4, %v1030_v36 }
 0xb07   :  { %3049 = vmatpush3.bf16.msra.mxu1 %v3411_v9  ;;  %2840 = vmatprep.mubr.msk.f32.mxu1 %vm3272_vm0, %v3273_v4 }
 0xb08   :  { %3050 = vmatprep.subr.bf16.mxu1 %v3271_v0 }
 0xb0b   :  { %3052 = vmatpush3.bf16.msra.mxu1 %v3431_v17 }
 0xb0c   :  { %3053 = vmatprep.subr.bf16.mxu1 %v3271_v0 }
 0xbba   :  { %v1204_v37 = vpop.f32.mrb[14].mxu0 }
 0xbbb   :  { %v1205_v38 = vadd.f32 %v3457_v24, %v1204_v37  ;;  %v2812_v39 = vpop.f32.mrb[15].mxu0 }
 0xbbd   :  { %1216 = vrot.lane.b32.xlu0 %v1205_v38, %s3274_s25  ;;  %v1208_v45 = vadd.f32 %v1205_v38, %v1135_v44 }
 0xbbf   :  { %v2493_v46 = vmul.f32 -1.442695, %v1208_v45 }
 0xbd9   :  { %v1100_v40 = vpop.f32.mrb[8].mxu1 }
 0xbda   :  { %v1101_v41 = vadd.f32 %v3581_v19, %v1100_v40  ;;  %v2801_v42 = vpop.f32.mrb[9].mxu1 }
 0xbdc   :  { %3172 = vtanh.f32 %v1101_v41  ;;  %v2491_v54 = vmul.f32 -1.442695, %v1101_v41 }
 0xbdd   :  { %3174 = vpow2.f32 %v2493_v46 }
 0xbe6   :  { %v3173_v43 = vpop.eup %3172 }
 0xbe7   :  { %1113 = vrot.lane.b32.xlu1 %v3173_v43, %s3274_s25  ;;  %v3175_v48 = vpop.eup %3174 }
 0xbe8   :  { %v1212_v50 = vadd.f32 1.0, %v3175_v48 }
 0xbea   :  { %3176 = vrcp.f32 %v1212_v50 }
 0xbeb   :  { %3178 = vpow2.f32 %v2491_v54 }
 0xbf4   :  { %v3177_v51 = vpop.eup %3176 }
 0xbf5   :  { %v3179_v56 = vpop.eup %3178  ;;  %v1226_v10 = vsub.f32 1.0, %v3177_v51  ;;  %v1232_v12 = vmul.f32 %v3177_v51, %v3675_v31 }
 0xbf6   :  { %v1107_v57 = vadd.f32 1.0, %v3179_v56 }
 0xbf8   :  { %3180 = vrcp.f32 %v1107_v57 }
 0xc02   :  { %v3181_v58 = vpop.eup %3180 }
 0xc03   :  { %v1111_v2 = vmul.f32 %v3181_v58, %v3670_v25 }
 0xc2f   :  { %v1217_v52 = vpop.permute.xlu0 %1216 }
 0xc30   :  { %v1219_v53 = vmul.f32 %v3177_v51, %v1217_v52 }
 0xc32   :  { %1221 = vrot.lane.b32.xlu0 %v1219_v53, %s3274_s25 }
 0xc59   :  { %v1114_v59 = vpop.permute.xlu1 %1113 }
 0xc5a   :  { %v1116_v60 = vmul.f32 %v3181_v58, %v1114_v59 }
 0xc5c   :  { %1118 = vrot.lane.b32.xlu1 %v1116_v60, %s3276_s8 }
 0xca4   :  { %v1222_v61 = vpop.permute.xlu0 %1221 }
 0xca5   :  { %v1224_v62 = vadd.f32 %v1222_v61, %v1135_v44 }
 0xca7   :  { %3182 = vtanh.f32 %v1224_v62 }
 0xcb1   :  { %v3183_v63 = vpop.eup %3182 }
 0xcb2   :  { %1228 = vrot.lane.b32.xlu0 %v3183_v63, %s3275_s23 }
 0xcce   :  { %v1119_v3 = vpop.permute.xlu1 %1118 }
 0xccf   :  { %v3710_v7 = vadd.f32 %v1119_v3, %v1111_v2 }
 0xcd1   :  { %3184 = vtanh.f32 %v3710_v7 }
 0xcdb   :  { %v3185_v8 = vpop.eup %3184 }
 0xcdc   :  { %1124 = vrot.lane.b32.xlu1 %v3185_v8, %s3274_s25 }
 0xd24   :  { %v1229_v11 = vpop.permute.xlu0 %1228 }
 0xd25   :  { %v1231_v13 = vmul.f32 %v1229_v11, %v1226_v10 }
 0xd27   :  { %v3715_v14 = vadd.f32 %v1232_v12, %v1231_v13  ;;  %v1557_v13 = vld [vmem:[#allocation2 + $0x30] sm:$0xff] }
 0xd29   :  { %1235 = vrot.lane.b32.xlu0 %v3715_v14, %s3275_s23 }
 0xd4e   :  { %v1125_v15 = vpop.permute.xlu1 %1124 }
 0xd4f   :  { %v3719_v16 = vmul.f32 %v3181_v58, %v1125_v15 }
 0xd51   :  { %1238 = vrot.lane.b32.xlu1 %v3719_v16, %s3274_s25 }
 0xd9b   :  { %v1236_v18 = vpop.permute.xlu0 %1235 }
 0xd9c   :  { %2841 = vmatmul.mubr.msk.f32.vlgmr.msra.gmra.mrb[10].mxu1 %vm287_vm3, %v1236_v18 }
 0xd9d   :  { %3055 = vmatpush3.bf16.msra.mxu1 %v3485_v47  ;;  %2859 = vmatprep.mubr.msk.f32.mxu1 %vm3272_vm0, %v3273_v4 }
 0xd9e   :  { %3056 = vmatprep.subr.bf16.mxu1 %v3271_v0 }
 0xda1   :  { %3058 = vmatpush3.bf16.msra.mxu1 %v3503_v55 }
 0xda2   :  { %3059 = vmatprep.subr.bf16.mxu1 %v3271_v0 }
 0xda5   :  { %3061 = vmatpush3.bf16.msra.mxu1 %v3521_v1 }
 0xda6   :  { %3062 = vmatprep.subr.bf16.mxu1 %v3271_v0 }
 0xda9   :  { %3064 = vmatpush3.bf16.msra.mxu1 %v3535_v6 }
 0xdaa   :  { %3083 = vmatprep.subr.bf16.mxu1 %v3271_v0 }
 0xdc3   :  { %v1239_v20 = vpop.permute.xlu1 %1238 }
 0xdc4   :  { %v1241_v21 = vsel %vm287_vm3, %v1236_v18, %v1239_v20 }
 0xdc5   :  { %2830 = vmatmul.mubr.msk.f32.vlgmr.msra.gmra.mrb[16].mxu0 %vm398_vm4, %v1241_v21 }
 0xdc6   :  { %3067 = vmatpush3.bf16.msra.mxu0 %v3411_v9  ;;  %2870 = vmatprep.mubr.msk.f32.mxu0 %vm3272_vm0, %v3273_v4 }
 0xdc7   :  { %3068 = vmatprep.subr.bf16.mxu0 %v3271_v0 }
 0xdca   :  { %3070 = vmatpush3.bf16.msra.mxu0 %v3431_v17 }
 0xdcb   :  { %3071 = vmatprep.subr.bf16.mxu0 %v3271_v0 }
 0xe6f   :  { %v1415_v22 = vpop.f32.mrb[10].mxu1 }
 0xe70   :  { %v1416_v23 = vadd.f32 %v3457_v24, %v1415_v22  ;;  %v2842_v25 = vpop.f32.mrb[11].mxu1 }
 0xe72   :  { %1427 = vrot.lane.b32.xlu0 %v1416_v23, %s3274_s25  ;;  %v1419_v31 = vadd.f32 %v1416_v23, %v1346_v30 }
 0xe74   :  { %v2497_v32 = vmul.f32 -1.442695, %v1419_v31 }
 0xe98   :  { %v1311_v26 = vpop.f32.mrb[16].mxu0 }
 0xe99   :  { %v1312_v27 = vadd.f32 %v3581_v19, %v1311_v26  ;;  %v2831_v28 = vpop.f32.mrb[17].mxu0 }
 0xe9b   :  { %3186 = vtanh.f32 %v1312_v27  ;;  %v2495_v39 = vmul.f32 -1.442695, %v1312_v27 }
 0xe9c   :  { %3188 = vpow2.f32 %v2497_v32 }
 0xea5   :  { %v3187_v29 = vpop.eup %3186 }
 0xea6   :  { %1324 = vrot.lane.b32.xlu1 %v3187_v29, %s3274_s25  ;;  %v3189_v34 = vpop.eup %3188 }
 0xea7   :  { %v1423_v35 = vadd.f32 1.0, %v3189_v34 }
 0xea9   :  { %3190 = vrcp.f32 %v1423_v35 }
 0xeaa   :  { %3192 = vpow2.f32 %v2495_v39 }
 0xeb3   :  { %v3191_v36 = vpop.eup %3190 }
 0xeb4   :  { %v3193_v40 = vpop.eup %3192  ;;  %v1437_v54 = vsub.f32 1.0, %v3191_v36  ;;  %v1443_v57 = vmul.f32 %v3191_v36, %v3715_v14 }
 0xeb5   :  { %v1318_v41 = vadd.f32 1.0, %v3193_v40 }
 0xeb7   :  { %3194 = vrcp.f32 %v1318_v41 }
 0xec1   :  { %v3195_v42 = vpop.eup %3194 }
 0xec2   :  { %v1322_v50 = vmul.f32 %v3195_v42, %v3710_v7 }
 0xee4   :  { %v1428_v37 = vpop.permute.xlu0 %1427 }
 0xee5   :  { %v1430_v38 = vmul.f32 %v3191_v36, %v1428_v37 }
 0xee7   :  { %1432 = vrot.lane.b32.xlu0 %v1430_v38, %s3274_s25 }
 0xf18   :  { %v1325_v43 = vpop.permute.xlu1 %1324 }
 0xf19   :  { %v1327_v44 = vmul.f32 %v3195_v42, %v1325_v43 }
 0xf1b   :  { %1329 = vrot.lane.b32.xlu1 %v1327_v44, %s3276_s8 }
 0xf59   :  { %v1433_v45 = vpop.permute.xlu0 %1432 }
 0xf5a   :  { %v1435_v46 = vadd.f32 %v1433_v45, %v1346_v30 }
 0xf5c   :  { %3196 = vtanh.f32 %v1435_v46 }
 0xf66   :  { %v3197_v48 = vpop.eup %3196 }
 0xf67   :  { %1439 = vrot.lane.b32.xlu0 %v3197_v48, %s3275_s23 }
 0xf8d   :  { %v1330_v51 = vpop.permute.xlu1 %1329 }
 0xf8e   :  { %v3750_v52 = vadd.f32 %v1330_v51, %v1322_v50 }
 0xf90   :  { %3198 = vtanh.f32 %v3750_v52 }
 0xf9a   :  { %v3199_v53 = vpop.eup %3198 }
 0xf9b   :  { %1335 = vrot.lane.b32.xlu1 %v3199_v53, %s3274_s25  ;;  %v1768_v53 = vld [vmem:[#allocation2 + $0x38] sm:$0xff] }
 0xfd9   :  { %v1440_v56 = vpop.permute.xlu0 %1439 }
 0xfda   :  { %v1442_v58 = vmul.f32 %v1440_v56, %v1437_v54 }
 0xfdc   :  { %v3755_v59 = vadd.f32 %v1443_v57, %v1442_v58 }
 0xfde   :  { %1446 = vrot.lane.b32.xlu0 %v3755_v59, %s3275_s23 }
0x100d   :  { %v1336_v60 = vpop.permute.xlu1 %1335 }
0x100e   :  { %v3759_v61 = vmul.f32 %v3195_v42, %v1336_v60 }
0x1010   :  { %1449 = vrot.lane.b32.xlu1 %v3759_v61, %s3274_s25 }
0x1050   :  { %v1447_v62 = vpop.permute.xlu0 %1446 }
0x1051   :  { %2871 = vmatmul.mubr.msk.f32.vlgmr.msra.gmra.mrb[18].mxu0 %vm287_vm3, %v1447_v62 }
0x1052   :  { %3073 = vmatpush3.bf16.msra.mxu0 %v3485_v47  ;;  %2889 = vmatprep.mubr.msk.f32.mxu0 %vm3272_vm0, %v3273_v4 }
0x1053   :  { %3074 = vmatprep.subr.bf16.mxu0 %v3271_v0 }
0x1056   :  { %3076 = vmatpush3.bf16.msra.mxu0 %v3503_v55 }
0x1057   :  { %3077 = vmatprep.subr.bf16.mxu0 %v3271_v0 }
0x105a   :  { %3079 = vmatpush3.bf16.msra.mxu0 %v3521_v1 }
0x105b   :  { %3080 = vmatprep.subr.bf16.mxu0 %v3271_v0 }
0x105e   :  { %3082 = vmatpush3.bf16.msra.mxu0 %v3535_v6 }
0x1082   :  { %v1450_v63 = vpop.permute.xlu1 %1449 }
0x1083   :  { %v1452_v2 = vsel %vm287_vm3, %v1447_v62, %v1450_v63 }
0x1084   :  { %2860 = vmatmul.mubr.msk.f32.vlgmr.msra.gmra.mrb[12].mxu1 %vm398_vm4, %v1452_v2 }
0x1085   :  { %3085 = vmatpush3.bf16.msra.mxu1 %v3411_v9  ;;  %2900 = vmatprep.mubr.msk.f32.mxu1 %vm3272_vm0, %v3273_v4 }
0x1086   :  { %3086 = vmatprep.subr.bf16.mxu1 %v3271_v0 }
0x1089   :  { %3088 = vmatpush3.bf16.msra.mxu1 %v3431_v17 }
0x108a   :  { %3089 = vmatprep.subr.bf16.mxu1 %v3271_v0 }
0x1124   :  { %v1626_v3 = vpop.f32.mrb[18].mxu0 }
0x1125   :  { %v1627_v7 = vadd.f32 %v3457_v24, %v1626_v3  ;;  %v2872_v8 = vpop.f32.mrb[19].mxu0 }
0x1127   :  { %1638 = vrot.lane.b32.xlu0 %v1627_v7, %s3274_s25  ;;  %v1630_v14 = vadd.f32 %v1627_v7, %v1557_v13 }
0x1129   :  { %v2501_v15 = vmul.f32 -1.442695, %v1630_v14 }
0x1157   :  { %v1522_v10 = vpop.f32.mrb[12].mxu1 }
0x1158   :  { %v1523_v11 = vadd.f32 %v3581_v19, %v1522_v10  ;;  %v2861_v12 = vpop.f32.mrb[13].mxu1 }
0x115a   :  { %3200 = vtanh.f32 %v1523_v11  ;;  %v2499_v22 = vmul.f32 -1.442695, %v1523_v11 }
0x115b   :  { %3202 = vpow2.f32 %v2501_v15 }
0x1164   :  { %v3201_v9 = vpop.eup %3200 }
0x1165   :  { %1535 = vrot.lane.b32.xlu1 %v3201_v9, %s3274_s25  ;;  %v3203_v17 = vpop.eup %3202 }
0x1166   :  { %v1634_v18 = vadd.f32 1.0, %v3203_v17 }
0x1168   :  { %3204 = vrcp.f32 %v1634_v18 }
0x1169   :  { %3206 = vpow2.f32 %v2499_v22 }
0x1172   :  { %v3205_v20 = vpop.eup %3204 }
0x1173   :  { %v3207_v23 = vpop.eup %3206  ;;  %v1648_v37 = vsub.f32 1.0, %v3205_v20  ;;  %v1654_v39 = vmul.f32 %v3205_v20, %v3755_v59 }
0x1174   :  { %v1529_v25 = vadd.f32 1.0, %v3207_v23 }
0x1176   :  { %3208 = vrcp.f32 %v1529_v25 }
0x1180   :  { %v3209_v26 = vpop.eup %3208 }
0x1181   :  { %v1533_v32 = vmul.f32 %v3209_v26, %v3750_v52 }
0x1199   :  { %v1639_v24 = vpop.permute.xlu0 %1638 }
0x119a   :  { %v1641_v21 = vmul.f32 %v3205_v20, %v1639_v24 }
0x119c   :  { %1643 = vrot.lane.b32.xlu0 %v1641_v21, %s3274_s25 }
0x11d7   :  { %v1536_v27 = vpop.permute.xlu1 %1535 }
0x11d8   :  { %v1538_v28 = vmul.f32 %v3209_v26, %v1536_v27 }
0x11da   :  { %1540 = vrot.lane.b32.xlu1 %v1538_v28, %s3276_s8 }
0x120e   :  { %v1644_v29 = vpop.permute.xlu0 %1643 }
0x120f   :  { %v1646_v30 = vadd.f32 %v1644_v29, %v1557_v13 }
0x1211   :  { %3210 = vtanh.f32 %v1646_v30 }
0x121b   :  { %v3211_v31 = vpop.eup %3210 }
0x121c   :  { %1650 = vrot.lane.b32.xlu0 %v3211_v31, %s3275_s23 }
0x124c   :  { %v1541_v34 = vpop.permute.xlu1 %1540 }
0x124d   :  { %v3789_v35 = vadd.f32 %v1541_v34, %v1533_v32 }
0x124f   :  { %3212 = vtanh.f32 %v3789_v35 }
0x1259   :  { %v3213_v36 = vpop.eup %3212 }
0x125a   :  { %1546 = vrot.lane.b32.xlu1 %v3213_v36, %s3274_s25 }
0x128e   :  { %v1651_v38 = vpop.permute.xlu0 %1650 }
0x128f   :  { %v1653_v40 = vmul.f32 %v1651_v38, %v1648_v37 }
0x1291   :  { %v3794_v41 = vadd.f32 %v1654_v39, %v1653_v40 }
0x1293   :  { %1657 = vrot.lane.b32.xlu0 %v3794_v41, %s3275_s23 }
0x12cc   :  { %v1547_v42 = vpop.permute.xlu1 %1546 }
0x12cd   :  { %v3798_v43 = vmul.f32 %v3209_v26, %v1547_v42  ;;  %v1987_v42 = vld [vmem:[%s4001_s9 + $0x8] sm:$0xff] }
0x12cf   :  { %1660 = vrot.lane.b32.xlu1 %v3798_v43, %s3274_s25 }
0x1305   :  { %v1658_v44 = vpop.permute.xlu0 %1657 }
0x1306   :  { %2901 = vmatmul.mubr.msk.f32.vlgmr.msra.gmra.mrb[14].mxu1 %vm287_vm3, %v1658_v44 }
0x1307   :  { %3091 = vmatpush3.bf16.msra.mxu1 %v3485_v47  ;;  %2919 = vmatprep.mubr.msk.f32.mxu1 %vm3272_vm0, %v3273_v4 }
0x1308   :  { %3092 = vmatprep.subr.bf16.mxu1 %v3271_v0 }
0x130b   :  { %3094 = vmatpush3.bf16.msra.mxu1 %v3503_v55  ;;  %v3270_v55 = vld [vmem:[%s3998_s6] ss:$0 sm:$0xff] }
0x130c   :  { %3095 = vmatprep.subr.bf16.mxu1 %v3271_v0 }
0x130f   :  { %3097 = vmatpush3.bf16.msra.mxu1 %v3521_v1 }
0x1310   :  { %3098 = vmatprep.subr.bf16.mxu1 %v3271_v0 }
0x1313   :  { %3100 = vmatpush3.bf16.msra.mxu1 %v3535_v6 }
0x1314   :  { %3109 = vmatprep.subr.bf16.mxu1 %v3271_v0 }
0x1341   :  { %v1661_v45 = vpop.permute.xlu1 %1660 }
0x1342   :  { %v1663_v47 = vsel %vm287_vm3, %v1658_v44, %v1661_v45 }
0x1343   :  { %2890 = vmatmul.mubr.msk.f32.vlgmr.msra.gmra.mrb[20].mxu0 %vm398_vm4, %v1663_v47 }
0x13d9   :  { %v1837_v46 = vpop.f32.mrb[14].mxu1 }
0x13da   :  { %v1838_v48 = vadd.f32 %v3270_v55, %v1837_v46  ;;  %v2902_v50 = vpop.f32.mrb[15].mxu1 }
0x13dc   :  { %1849 = vrot.lane.b32.xlu0 %v1838_v48, %s3274_s25  ;;  %v1841_v54 = vadd.f32 %v1838_v48, %v1768_v53 }
0x13de   :  { %v2505_v56 = vmul.f32 -1.442695, %v1841_v54 }
0x1416   :  { %v1733_v1 = vpop.f32.mrb[20].mxu0 }
0x1417   :  { %v1734_v51 = vadd.f32 %v3581_v19, %v1733_v1  ;;  %v2891_v6 = vpop.f32.mrb[21].mxu0 }
0x1419   :  { %3214 = vtanh.f32 %v1734_v51  ;;  %v2503_v63 = vmul.f32 -1.442695, %v1734_v51 }
0x141a   :  { %3216 = vpow2.f32 %v2505_v56 }
0x1423   :  { %v3215_v52 = vpop.eup %3214 }
0x1424   :  { %1746 = vrot.lane.b32.xlu1 %v3215_v52, %s3274_s25  ;;  %v3217_v57 = vpop.eup %3216 }
0x1425   :  { %v1845_v58 = vadd.f32 1.0, %v3217_v57 }
0x1427   :  { %3218 = vrcp.f32 %v1845_v58 }
0x1428   :  { %3220 = vpow2.f32 %v2503_v63 }
0x1431   :  { %v3219_v59 = vpop.eup %3218 }
0x1432   :  { %v3221_v2 = vpop.eup %3220  ;;  %v1859_v18 = vsub.f32 1.0, %v3219_v59  ;;  %v1865_v24 = vmul.f32 %v3219_v59, %v3794_v41  ;;  %v1986_v41 = vld [vmem:[%s4001_s9] sm:$0xff] }
0x1433   :  { %v1740_v3 = vadd.f32 1.0, %v3221_v2 }
0x1435   :  { %3222 = vrcp.f32 %v1740_v3 }
0x143f   :  { %v3223_v7 = vpop.eup %3222 }
0x1440   :  { %v1744_v13 = vmul.f32 %v3223_v7, %v3789_v35 }
0x144e   :  { %v1850_v60 = vpop.permute.xlu0 %1849 }
0x144f   :  { %v1852_v62 = vmul.f32 %v3219_v59, %v1850_v60  ;;  %v2516_v60 = vld [vmem:[%s4002_s10] ss:$0 sm:$0xff] }
0x1451   :  { %1854 = vrot.lane.b32.xlu0 %v1852_v62, %s3274_s25 }
0x1496   :  { %v1747_v8 = vpop.permute.xlu1 %1746 }
0x1497   :  { %v1749_v10 = vmul.f32 %v3223_v7, %v1747_v8  ;;  %v26_v8 = vstv %s4003_s12 }
0x1498   :  { %27 = vst [vmem:[#allocation4] sm:$0x1] %v26_v8 }
0x1499   :  { %1751 = vrot.lane.b32.xlu1 %v1749_v10, %s3276_s8 }
0x14c3   :  { %v1855_v11 = vpop.permute.xlu0 %1854 }
0x14c4   :  { %v1857_v12 = vadd.f32 %v1855_v11, %v1768_v53 }
0x14c6   :  { %3224 = vtanh.f32 %v1857_v12 }
0x14d0   :  { %v3225_v9 = vpop.eup %3224 }
0x14d1   :  { %1861 = vrot.lane.b32.xlu0 %v3225_v9, %s3275_s23 }
0x150b   :  { %v1752_v14 = vpop.permute.xlu1 %1751 }
0x150c   :  { %v1754_v15 = vadd.f32 %v1752_v14, %v1744_v13 }
0x150e   :  { %3226 = vtanh.f32 %v1754_v15 }
0x1518   :  { %v3227_v17 = vpop.eup %3226 }
0x1519   :  { %1757 = vrot.lane.b32.xlu1 %v3227_v17, %s3274_s25  ;;  %v2517_v17 = vld [vmem:[%s4004_s11] ss:$0 sm:$0xff] }
0x1543   :  { %v1862_v20 = vpop.permute.xlu0 %1861 }
0x1544   :  { %v1864_v21 = vmul.f32 %v1862_v20, %v1859_v18 }
0x1546   :  { %v1866_v22 = vadd.f32 %v1865_v24, %v1864_v21 }
0x1548   :  { %1868 = vrot.lane.b32.xlu0 %v1866_v22, %s3275_s23 }
0x158b   :  { %v1758_v23 = vpop.permute.xlu1 %1757 }
0x158c   :  { %v1760_v25 = vmul.f32 %v3223_v7, %v1758_v23 }
0x158e   :  { %1871 = vrot.lane.b32.xlu1 %v1760_v25, %s3274_s25 }
0x15ba   :  { %v1869_v26 = vpop.permute.xlu0 %1868 }
0x1600   :  { %v1872_v27 = vpop.permute.xlu1 %1871 }
0x1601   :  { %v1874_v28 = vsel %vm287_vm3, %v1869_v26, %v1872_v27 }
0x1602   :  { %2920 = vmatmul.mubr.msk.f32.vlgmr.msra.gmra.mrb[16].mxu1 %vm398_vm4, %v1874_v28 }
0x1603   :  { %2950 = vmatprep.mubr.msk.f32.mxu1 %vm3272_vm0, %v3273_v4 }
0x16d5   :  { %v1944_v29 = vpop.f32.mrb[16].mxu1 }
0x16d6   :  { %v1945_v30 = vadd.f32 %v3581_v19, %v1944_v29  ;;  %v2921_v31 = vpop.f32.mrb[17].mxu1 }
0x16d8   :  { %3228 = vtanh.f32 %v1945_v30  ;;  %v2507_v34 = vmul.f32 -1.442695, %v1945_v30 }
0x16da   :  { %3230 = vpow2.f32 %v2507_v34 }
0x16e2   :  { %v3229_v32 = vpop.eup %3228 }
0x16e3   :  { %1957 = vrot.lane.b32.xlu0 %v3229_v32, %s3274_s25 }
0x16e4   :  { %v3231_v35 = vpop.eup %3230 }
0x16e5   :  { %v1951_v36 = vadd.f32 1.0, %v3231_v35 }
0x16e7   :  { %3232 = vrcp.f32 %v1951_v36 }
0x16f1   :  { %v3233_v37 = vpop.eup %3232 }
0x16f2   :  { %v1955_v4 = vmul.f32 %v3233_v37, %v1754_v15 }
0x1755   :  { %v1958_v38 = vpop.permute.xlu0 %1957 }
0x1756   :  { %v1960_v39 = vmul.f32 %v3233_v37, %v1958_v38 }
0x1758   :  { %1962 = vrot.lane.b32.xlu1 %v1960_v39, %s3276_s8 }
0x175c   :  { %497 = vrot.lane.b32.xlu1 %v3599_v5, %s3276_s8  ;;  %v3101_v5 = vpack.c.bf16 %v1987_v42, %v1986_v41 }
0x175e   :  { %3102 = vmatprep.subr.bf16.mxu0 %v3101_v5 }
0x175f   :  { %3104 = vmatpush3.bf16.msra.mxu0 %v3101_v5 }
0x1760   :  { %918 = vrot.lane.b32.xlu1 %v3679_v33, %s3276_s8  ;;  %v1988_v33 = vld [vmem:[%s4001_s9 + $0x10] sm:$0xff] }
0x1764   :  { %1340 = vrot.lane.b32.xlu1 %v3759_v61, %s3276_s8  ;;  %v1989_v61 = vld [vmem:[%s4001_s9 + $0x18] sm:$0xff] }
0x1765   :  { %v3105_v45 = vpack.c.bf16 %v1989_v61, %v1988_v33  ;;  %v3277_v61 = vmov 0  }
0x1766   :  { %3123 = vset.pattern.permute.xlu1 %v3277_v61  ;;  %3122 = vset.pattern.permute.xlu0 %v3277_v61 }
0x1767   :  { %3106 = vmatprep.subr.bf16.mxu0 %v3105_v45 }
0x1768   :  { %1762 = vrot.lane.b32.xlu1 %v1760_v25, %s3276_s8  ;;  %3108 = vmatpush3.bf16.msra.mxu0 %v3105_v45 }
0x17ca   :  { %v1963_v19 = vpop.permute.xlu1 %1962 }
0x17cb   :  { %v1965_v40 = vadd.f32 %v1963_v19, %v1955_v4 }
0x17cd   :  { %3234 = vtanh.f32 %v1965_v40 }
0x17ce   :  { %v498_v44 = vpop.permute.xlu1 %497 }
0x17cf   :  { %500 = vst.msk [vmem:[#allocation3] sm:$0xff] %vm287_vm3, %v498_v44 }
0x17d2   :  { %v919_v47 = vpop.permute.xlu1 %918 }
0x17d3   :  { %922 = vst.msk [vmem:[#allocation3 + $0x10] sm:$0xff] %vm287_vm3, %v919_v47 }
0x17d6   :  { %v1341_v46 = vpop.permute.xlu1 %1340  ;;  %v3857_v55 = vld [vmem:[#allocation3] sm:$0xff] }
0x17d7   :  { %v3235_v48 = vpop.eup %3234  ;;  %1344 = vst.msk [vmem:[#allocation3 + $0x20] sm:$0xff] %vm287_vm3, %v1341_v46  ;;  %2930 = vmatprep.mubr.msk.f32.mxu0 %vm287_vm3, %v3857_v55 }
0x17d8   :  { %1968 = vrot.lane.b32.xlu0 %v3235_v48, %s3274_s25 }
0x17da   :  { %v1763_v50 = vpop.permute.xlu1 %1762 }
0x17db   :  { %1766 = vst.msk [vmem:[#allocation3 + $0x30] sm:$0xff] %vm287_vm3, %v1763_v50 }
0x17dc   :  { %707 = vrot.lane.b32.xlu0 %v3639_v49, %s3276_s8  ;;  %v3878_v49 = vld [vmem:[#allocation3 + $0x10] sm:$0xff] }
0x17e0   :  { %1129 = vrot.lane.b32.xlu0 %v3719_v16, %s3276_s8 }
0x17e2   :  { %v3894_v57 = vld [vmem:[#allocation3 + $0x30] sm:$0xff] }
0x17e4   :  { %1551 = vrot.lane.b32.xlu0 %v3798_v43, %s3276_s8  ;;  %v3886_v43 = vld [vmem:[#allocation3 + $0x20] sm:$0xff] }
0x184a   :  { %v1969_v1 = vpop.permute.xlu0 %1968 }
0x184b   :  { %v1971_v51 = vmul.f32 %v3233_v37, %v1969_v1 }
0x184d   :  { %1973 = vrot.lane.b32.xlu0 %v1971_v51, %s3276_s8  ;;  %v2518_v51 = vld [vmem:[#allocation4] ss:$0 sm:$0xff] }
0x184e   :  { %v708_v6 = vpop.permute.xlu0 %707 }
0x184f   :  { %711 = vst.msk [vmem:[#allocation3 + $0x8] sm:$0xff] %vm287_vm3, %v708_v6 }
0x1852   :  { %v1130_v52 = vpop.permute.xlu0 %1129 }
0x1853   :  { %1133 = vst.msk [vmem:[#allocation3 + $0x18] sm:$0xff] %vm287_vm3, %v1130_v52 }
0x1856   :  { %v1552_v53 = vpop.permute.xlu0 %1551  ;;  %v3873_v54 = vld [vmem:[#allocation3 + $0x8] sm:$0xff] }
0x1857   :  { %1555 = vst.msk [vmem:[#allocation3 + $0x28] sm:$0xff] %vm287_vm3, %v1552_v53  ;;  %2931 = vmatmul.mubr.msk.f32.vlgmr.msra.gmra.mrb[22].mxu0 %vm287_vm3, %v3873_v54 }
0x1858   :  { %2933 = vmatprep.mubr.msk.f32.mxu0 %vm287_vm3, %v3878_v49 }
0x185a   :  { %v3882_v16 = vld [vmem:[#allocation3 + $0x18] sm:$0xff] }
0x185b   :  { %2934 = vmatmul.mubr.msk.f32.gmra.mrb[24].mxu0 %vm287_vm3, %v3882_v16 }
0x185c   :  { %2936 = vmatprep.mubr.msk.f32.mxu0 %vm287_vm3, %v3886_v43 }
0x185e   :  { %v3890_v56 = vld [vmem:[#allocation3 + $0x28] sm:$0xff] }
0x185f   :  { %2937 = vmatmul.mubr.msk.f32.gmra.mrb[26].mxu0 %vm287_vm3, %v3890_v56 }
0x1860   :  { %2939 = vmatprep.mubr.msk.f32.mxu0 %vm287_vm3, %v3894_v57 }
0x18bf   :  { %v1974_v58 = vpop.permute.xlu0 %1973 }
0x18c0   :  { %1977 = vst.msk [vmem:[#allocation3 + $0x38] sm:$0xff] %vm287_vm3, %v1974_v58 }
0x18c7   :  { %v3899_v59 = vld [vmem:[#allocation3 + $0x38] sm:$0xff] }
0x18c8   :  { %2940 = vmatmul.mubr.msk.f32.gmra.mrb[28].mxu0 %vm287_vm3, %v3899_v59 }
0x192a   :  { %v2932_v62 = vpop.f32.mrb[22].mxu0 }
0x192b   :  { %v2127_v63 = vadd.f32 %v2932_v62, %v2516_v60  ;;  %v2080_v2 = vpop.f32.mrb[23].mxu0 }
0x192c   :  { %v2126_v3 = vadd.f32 %v2516_v60, %v2080_v2 }
0x192d   :  { %3236 = vtanh.f32 %v2127_v63 }
0x192e   :  { %3238 = vtanh.f32 %v2126_v3  ;;  %v2935_v7 = vpop.f32.mrb[24].mxu0 }
0x192f   :  { %v2129_v10 = vadd.f32 %v2935_v7, %v2516_v60  ;;  %v2090_v11 = vpop.f32.mrb[25].mxu0 }
0x1930   :  { %v2128_v12 = vadd.f32 %v2516_v60, %v2090_v11 }
0x1931   :  { %3240 = vtanh.f32 %v2129_v10 }
0x1932   :  { %3242 = vtanh.f32 %v2128_v12  ;;  %v2938_v9 = vpop.f32.mrb[26].mxu0 }
0x1933   :  { %v2131_v13 = vadd.f32 %v2938_v9, %v2516_v60  ;;  %v2100_v14 = vpop.f32.mrb[27].mxu0 }
0x1934   :  { %v2130_v15 = vadd.f32 %v2516_v60, %v2100_v14 }
0x1935   :  { %3244 = vtanh.f32 %v2131_v13 }
0x1936   :  { %3246 = vtanh.f32 %v2130_v15 }
0x1937   :  { %v3237_v18 = vpop.eup %3236 }
0x1938   :  { %v3239_v20 = vpop.eup %3238  ;;  %v2150_v24 = vmul.f32 %v3237_v18, %v2517_v17 }
0x1939   :  { %v2149_v21 = vmul.f32 %v3239_v20, %v2517_v17 }
0x193a   :  { %v2160_v22 = vsel %vm126_vm1, %v2150_v24, 0.0 }
0x193b   :  { %v3241_v23 = vpop.eup %3240  ;;  %2161 = vadd.xlane.f32.xlu0 %v2160_v22  ;;  %v2157_v25 = vsel %vm126_vm1, %v2149_v21, 0.0 }
0x193c   :  { %v3243_v26 = vpop.eup %3242  ;;  %2158 = vadd.xlane.f32.xlu1 %v2157_v25  ;;  %v2152_v27 = vmul.f32 %v3241_v23, %v2517_v17 }
0x193d   :  { %v2151_v28 = vmul.f32 %v3243_v26, %v2517_v17 }
0x193e   :  { %v2166_v29 = vsel %vm126_vm1, %v2152_v27, 0.0 }
0x193f   :  { %v3245_v30 = vpop.eup %3244  ;;  %v2163_v31 = vsel %vm126_vm1, %v2151_v28, 0.0 }
0x1940   :  { %v3247_v32 = vpop.eup %3246  ;;  %2167 = vadd.xlane.f32.xlu1 %v2166_v29  ;;  %2164 = vadd.xlane.f32.xlu0 %v2163_v31  ;;  %v2154_v34 = vmul.f32 %v3245_v30, %v2517_v17 }
0x1941   :  { %v2153_v35 = vmul.f32 %v3247_v32, %v2517_v17 }
0x1942   :  { %v2172_v36 = vsel %vm126_vm1, %v2154_v34, 0.0 }
0x1943   :  { %v2169_v37 = vsel %vm126_vm1, %v2153_v35, 0.0 }
0x1944   :  { %2173 = vadd.xlane.f32.xlu1 %v2172_v36  ;;  %2170 = vadd.xlane.f32.xlu0 %v2169_v37 }
0x199b   :  { %v2941_v38 = vpop.f32.mrb[28].mxu0 }
0x199c   :  { %v2133_v39 = vadd.f32 %v2941_v38, %v2516_v60  ;;  %v2110_v4 = vpop.f32.mrb[29].mxu0 }
0x199d   :  { %v2132_v19 = vadd.f32 %v2516_v60, %v2110_v4 }
0x199e   :  { %3248 = vtanh.f32 %v2133_v39 }
0x199f   :  { %3250 = vtanh.f32 %v2132_v19 }
0x19a8   :  { %v3249_v40 = vpop.eup %3248 }
0x19a9   :  { %v3251_v41 = vpop.eup %3250  ;;  %v2156_v42 = vmul.f32 %v3249_v40, %v2517_v17 }
0x19aa   :  { %v2155_v5 = vmul.f32 %v3251_v41, %v2517_v17 }
0x19ab   :  { %v2178_v44 = vsel %vm126_vm1, %v2156_v42, 0.0 }
0x19ac   :  { %2179 = vadd.xlane.f32.xlu1 %v2178_v44  ;;  %v2175_v33 = vsel %vm126_vm1, %v2155_v5, 0.0 }
0x19ad   :  { %2176 = vadd.xlane.f32.xlu0 %v2175_v33 }
0x19c8   :  { %v2162_v45 = vpop.xlane.xlu0 %2161 }
0x19c9   :  { %v2159_v47 = vpop.xlane.xlu1 %2158  ;;  %v2189_v53 = vadd.f32 %v2518_v51, %v2162_v45 }
0x19ca   :  { %v2188_v58 = vadd.f32 %v2518_v51, %v2159_v47 }
0x19cb   :  { %v2198_v10 = vsel %vm2196_vm5, %v2189_v53, -inf }
0x19cc   :  { %v2197_v11 = vsel %vm2196_vm5, %v2188_v58, -inf }
0x19cd   :  { %v2168_v46 = vpop.xlane.xlu1 %2167  ;;  %v2165_v48 = vpop.xlane.xlu0 %2164 }
0x19ce   :  { %v2191_v60 = vadd.f32 %v2518_v51, %v2168_v46  ;;  %v2190_v62 = vadd.f32 %v2518_v51, %v2165_v48 }
0x19d0   :  { %v2200_v9 = vsel %vm2196_vm5, %v2191_v60, -inf  ;;  %v2199_v17 = vsel %vm2196_vm5, %v2190_v62, -inf }
0x19d1   :  { %v2174_v50 = vpop.xlane.xlu1 %2173  ;;  %v2171_v1 = vpop.xlane.xlu0 %2170 }
0x19d2   :  { %v2193_v6 = vadd.f32 %v2518_v51, %v2174_v50  ;;  %v2192_v52 = vadd.f32 %v2518_v51, %v2171_v1 }
0x19d4   :  { %v2203_v63 = vsel %vm2196_vm5, %v2193_v6, -inf  ;;  %v2201_v2 = vsel %vm2196_vm5, %v2192_v52, -inf }
0x19d5   :  { %v2204_v13 = vmax.f32 %v2198_v10, %v2203_v63  ;;  %v2202_v14 = vmax.f32 %v2197_v11, %v2201_v2 }
0x19d7   :  { %v2209_v21 = vmax.f32 %v2202_v14, %v2204_v13 }
0x1a39   :  { %v2180_v3 = vpop.xlane.xlu1 %2179 }
0x1a3a   :  { %v2195_v7 = vadd.f32 %v2518_v51, %v2180_v3  ;;  %v2177_v8 = vpop.xlane.xlu0 %2176 }
0x1a3b   :  { %v2194_v12 = vadd.f32 %v2518_v51, %v2177_v8 }
0x1a3c   :  { %v2207_v15 = vsel %vm2196_vm5, %v2195_v7, -inf }
0x1a3d   :  { %v2208_v18 = vmax.f32 %v2200_v9, %v2207_v15  ;;  %v2205_v20 = vsel %vm2196_vm5, %v2194_v12, -inf }
0x1a3e   :  { %v2206_v24 = vmax.f32 %v2199_v17, %v2205_v20  ;;  %v2339_v17 = vld [vmem:[%s4005_s15] sm:$0xff] }
0x1a40   :  { %v2210_v22 = vmax.f32 %v2206_v24, %v2208_v18  ;;  %v2340_v18 = vld [vmem:[%s4005_s15 + $0x8] sm:$0xff]  ;;  %v2341_v24 = vld [vmem:[%s4005_s15 + $0x10] sm:$0xff] }
0x1a41   :  { %v3110_v20 = vpack.c.bf16 %v2340_v18, %v2339_v17 }
0x1a42   :  { %v2211_v23 = vmax.f32 %v2209_v21, %v2210_v22  ;;  %v2342_v21 = vld [vmem:[%s4005_s15 + $0x18] sm:$0xff] }
0x1a43   :  { %3111 = vmatpush3.bf16.msra.mxu1 %v3110_v20  ;;  %v3113_v22 = vpack.c.bf16 %v2342_v21, %v2341_v24 }
0x1a44   :  { %v2214_v25 = vsub.f32 %v2190_v62, %v2211_v23  ;;  %v2212_v26 = vsub.f32 %v2188_v58, %v2211_v23  ;;  %v2213_v27 = vsub.f32 %v2189_v53, %v2211_v23  ;;  %v2215_v28 = vsub.f32 %v2191_v60, %v2211_v23  ;;  %3112 = vmatprep.subr.bf16.mxu1 %v3271_v0 }
0x1a45   :  { %v2216_v31 = vsub.f32 %v2192_v52, %v2211_v23  ;;  %v2217_v34 = vsub.f32 %v2193_v6, %v2211_v23  ;;  %v2218_v36 = vsub.f32 %v2194_v12, %v2211_v23  ;;  %v2219_v38 = vsub.f32 %v2195_v7, %v2211_v23 }
0x1a46   :  { %v2224_v29 = vmul.f32 1.442695, %v2214_v25  ;;  %v2220_v30 = vmul.f32 1.442695, %v2212_v26  ;;  %v2222_v32 = vmul.f32 1.442695, %v2213_v27 }
0x1a47   :  { %v2226_v35 = vmul.f32 1.442695, %v2215_v28  ;;  %v2228_v37 = vmul.f32 1.442695, %v2216_v31  ;;  %v2230_v39 = vmul.f32 1.442695, %v2217_v34  ;;  %3114 = vmatpush3.bf16.msra.mxu1 %v3113_v22 }
0x1a48   :  { %3252 = vpow2.f32 %v2224_v29  ;;  %v2232_v4 = vmul.f32 1.442695, %v2218_v36  ;;  %v2234_v19 = vmul.f32 1.442695, %v2219_v38 }
0x1a49   :  { %3254 = vpow2.f32 %v2220_v30 }
0x1a4a   :  { %3256 = vpow2.f32 %v2222_v32 }
0x1a4b   :  { %3258 = vpow2.f32 %v2226_v35 }
0x1a4c   :  { %3260 = vpow2.f32 %v2228_v37 }
0x1a4d   :  { %3262 = vpow2.f32 %v2230_v39 }
0x1a4e   :  { %3264 = vpow2.f32 %v2232_v4 }
0x1a4f   :  { %3266 = vpow2.f32 %v2234_v19 }
0x1a52   :  { %v3253_v40 = vpop.eup %3252 }
0x1a53   :  { %v3255_v41 = vpop.eup %3254  ;;  %v2239_v45 = vsel %vm2196_vm5, %v3253_v40, 0.0 }
0x1a54   :  { %v3257_v42 = vpop.eup %3256  ;;  %v2236_v5 = vsel %vm2196_vm5, %v3255_v41, 0.0 }
0x1a55   :  { %v2237_v44 = vsel %vm2196_vm5, %v3257_v42, 0.0  ;;  %v3259_v33 = vpop.eup %3258 }
0x1a56   :  { %v2238_v61 = vadd.f32 %v2237_v44, %v2236_v5  ;;  %v3261_v47 = vpop.eup %3260  ;;  %v2241_v48 = vsel %vm2196_vm5, %v3259_v33, 0.0 }
0x1a57   :  { %v3263_v50 = vpop.eup %3262  ;;  %v2243_v51 = vsel %vm2196_vm5, %v3261_v47, 0.0 }
0x1a58   :  { %v2240_v46 = vadd.f32 %v2239_v45, %v2238_v61  ;;  %v3265_v6 = vpop.eup %3264  ;;  %v2245_v53 = vsel %vm2196_vm5, %v3263_v50, 0.0 }
0x1a59   :  { %v3267_v58 = vpop.eup %3266  ;;  %v2247_v62 = vsel %vm2196_vm5, %v3265_v6, 0.0 }
0x1a5a   :  { %v2242_v1 = vadd.f32 %v2241_v48, %v2240_v46  ;;  %v2249_v2 = vsel %vm2196_vm5, %v3267_v58, 0.0  ;;  %v2521_v48 = vld [vmem:[%s4009_s16] ss:$0 sm:$0xff] }
0x1a5c   :  { %v2244_v52 = vadd.f32 %v2243_v51, %v2242_v1 }
0x1a5e   :  { %v2246_v60 = vadd.f32 %v2245_v53, %v2244_v52  ;;  %v2524_v53 = vld [vmem:[%s4011_s18] ss:$0 sm:$0xff] }
0x1a60   :  { %v2248_v63 = vadd.f32 %v2247_v62, %v2246_v60  ;;  %v2525_v60 = vld [vmem:[%s4012_s19] ss:$0 sm:$0xff] }
0x1a62   :  { %v2250_v3 = vadd.f32 %v2249_v2, %v2248_v63 }
0x1a64   :  { %3268 = vrcp.f32 %v2250_v3 }
0x1a6e   :  { %v3269_v7 = vpop.eup %3268 }
0x1a6f   :  { %v2253_v8 = vmul.f32 %v3269_v7, %v3257_v42  ;;  %v2252_v10 = vmul.f32 %v3269_v7, %v3255_v41  ;;  %v2254_v11 = vmul.f32 %v3269_v7, %v3253_v40  ;;  %v2255_v12 = vmul.f32 %v3269_v7, %v3259_v33 }
0x1a70   :  { %v2256_v9 = vmul.f32 %v3269_v7, %v3261_v47  ;;  %v2257_v13 = vmul.f32 %v3269_v7, %v3263_v50  ;;  %v2258_v14 = vmul.f32 %v3269_v7, %v3265_v6  ;;  %v2259_v15 = vmul.f32 %v3269_v7, %v3267_v58  ;;  %v2520_v47 = vld [vmem:[%s4007_s14] ss:$0 sm:$0xff] }
0x1a71   :  { %2267 = vperm.xlu1 %3123, %v2253_v8   ;;  %2262 = vperm.xlu0 %3122, %v2252_v10   ;;  %v2523_v6 = vld [vmem:[%s4010_s17] ss:$0 sm:$0xff] }
0x1a75   :  { %2272 = vperm.xlu1 %3123, %v2254_v11  }
0x1a79   :  { %2277 = vperm.xlu1 %3123, %v2255_v12  }
0x1a7d   :  { %2282 = vperm.xlu1 %3123, %v2256_v9  }
0x1a81   :  { %2287 = vperm.xlu1 %3123, %v2257_v13  }
0x1a85   :  { %2292 = vperm.xlu1 %3123, %v2258_v14  }
0x1a89   :  { %2297 = vperm.xlu1 %3123, %v2259_v15  }
0x1af0   :  { %v2268_v23 = vpop.permute.xlu1 %2267  ;;  %v2263_v26 = vpop.permute.xlu0 %2262 }
0x1af1   :  { %v2301_v28 = vmul.f32 %v2268_v23, %v3873_v54  ;;  %v2300_v29 = vmul.f32 %v2263_v26, %v3857_v55 }
0x1af3   :  { %v2309_v32 = vsel %vm287_vm3, %v2301_v28, 0.0  ;;  %v2308_v34 = vsel %vm287_vm3, %v2300_v29, 0.0 }
0x1af4   :  { %v2273_v25 = vpop.permute.xlu1 %2272  ;;  %v2310_v37 = vadd.f32 %v2309_v32, %v2308_v34 }
0x1af5   :  { %v2302_v30 = vmul.f32 %v2273_v25, %v3878_v49 }
0x1af7   :  { %v2311_v0 = vsel %vm287_vm3, %v2302_v30, 0.0 }
0x1af8   :  { %v2278_v27 = vpop.permute.xlu1 %2277  ;;  %v2312_v55 = vadd.f32 %v2311_v0, %v2310_v37 }
0x1af9   :  { %v2303_v35 = vmul.f32 %v2278_v27, %v3882_v16 }
0x1afb   :  { %v2313_v39 = vsel %vm287_vm3, %v2303_v35, 0.0 }
0x1afc   :  { %v2283_v31 = vpop.permute.xlu1 %2282  ;;  %v2314_v4 = vadd.f32 %v2313_v39, %v2312_v55 }
0x1afd   :  { %v2304_v36 = vmul.f32 %v2283_v31, %v3886_v43 }
0x1aff   :  { %v2315_v49 = vsel %vm287_vm3, %v2304_v36, 0.0 }
0x1b00   :  { %v2288_v38 = vpop.permute.xlu1 %2287  ;;  %v2316_v16 = vadd.f32 %v2315_v49, %v2314_v4 }
0x1b01   :  { %v2305_v54 = vmul.f32 %v2288_v38, %v3890_v56  ;;  %v2519_v56 = vld [vmem:[%s4006_s13] ss:$0 sm:$0xff] }
0x1b03   :  { %v2317_v40 = vsel %vm287_vm3, %v2305_v54, 0.0 }
0x1b04   :  { %v2293_v19 = vpop.permute.xlu1 %2292  ;;  %v2318_v5 = vadd.f32 %v2317_v40, %v2316_v16 }
0x1b05   :  { %v2306_v41 = vmul.f32 %v2293_v19, %v3894_v57 }
0x1b07   :  { %v2319_v42 = vsel %vm287_vm3, %v2306_v41, 0.0 }
0x1b08   :  { %v2298_v43 = vpop.permute.xlu1 %2297  ;;  %v2320_v33 = vadd.f32 %v2319_v42, %v2318_v5 }
0x1b09   :  { %v2307_v44 = vmul.f32 %v2298_v43, %v3899_v59  ;;  %v28_v59 = vstv %s4008_s20 }
0x1b0a   :  { %29 = vst [vmem:[#allocation5] sm:$0x1] %v28_v59 }
0x1b0b   :  { %v2321_v61 = vsel %vm287_vm3, %v2307_v44, 0.0 }
0x1b0c   :  { %v2322_v45 = vadd.f32 %v2321_v61, %v2320_v33 }
0x1b0e   :  { %v2330_v57 = vmul.f32 %v2519_v56, %v2322_v45 }
0x1b10   :  { %v2338_v46 = vadd.f32 %v2520_v47, %v2330_v57 }
0x1b11   :  { %v2526_v3 = vld [vmem:[#allocation5] ss:$0 sm:$0xff] }
0x1b12   :  { %2951 = vmatmul.mubr.msk.f32.vlgmr.msra.gmra.mrb[18].mxu1 %vm287_vm3, %v2338_v46 }
0x1be5   :  { %v2419_v50 = vpop.f32.mrb[18].mxu1 }
0x1be6   :  { %v2420_v1 = vadd.f32 %v2521_v48, %v2419_v50  ;;  %v2952_v51 = vpop.f32.mrb[19].mxu1 }
0x1be8   :  { %v2423_v52 = vmax.f32 %v2420_v1, 0.0 }
0x1bea   :  { %v2431_v58 = vmul.f32 %v2523_v6, %v2423_v52 }
0x1bec   :  { %v2439_v62 = vadd.f32 %v2524_v53, %v2431_v58 }
0x1bee   :  { %v2447_v63 = vmul.f32 %v2525_v60, %v2439_v62 }
0x1bf0   :  { %v2448_v2 = vsel %vm126_vm1, %v2447_v63, 0.0 }
0x1bf1   :  { %2449 = vadd.xlane.f32.xlu1 %v2448_v2 }
0x1c7e   :  { %v2450_v7 = vpop.xlane.xlu1 %2449 }
0x1c7f   :  { %v2458_v8 = vadd.f32 %v2526_v3, %v2450_v7 }
0x1c81   :  { %2459 = vst.msk [vmem:[%s4013_s21] sm:$0xff] %vm2196_vm5, %v2458_v8 }

</bundles_post_ra>
